<compile_context>
chip_gen: v6e
topology: v6e:2x2x1
jax: 0.10.0
libtpu: 0.0.40
codegen_flags: <defaults>
</compile_context>

<pallas_src>
import functools

import jax
import jax.numpy as jnp
from jax.experimental import pallas as pl
from jax.experimental.pallas import tpu as pltpu


# ----------------------------- config ---------------------------------------
class Cfg:
    vocab_size = 50
    type_vocab_size = 2
    max_position = 16
    hidden = 32
    num_heads = 2
    head_dim = 16            # hidden // num_heads
    intermediate = 64
    num_layers = 2
    num_labels = 3
    ln_eps = 1e-12


# 128-lane-aligned offsets inside the packed per-layer weight slab.
_OFF_QKV = 0      # (H, 3H)
_OFF_WO = 128     # (H, H)
_OFF_WI = 256     # (H, FF)
_OFF_WO2 = 384    # (FF, H)
_W_LANES = 512


# ----------------------------- kernel helpers --------------------------------
def _layernorm(h, g, b, eps):
    mu = jnp.mean(h, axis=-1, keepdims=True)
    d = h - mu
    var = jnp.mean(d * d, axis=-1, keepdims=True)
    return d * jax.lax.rsqrt(var + eps) * g + b


def _gelu_tanh(y):
    # tanh-approx GELU (HF BERT defaults to erf GELU; diff < 1e-3).
    return 0.5 * y * (1.0 + jnp.tanh(0.7978845608028654 * (y + 0.044715 * y * y * y)))


# ----------------------------- fused forward kernel --------------------------
def _fused_bert_kernel(B, S, H, nH, D, FF, L, eps, scale,
                       # inputs (5 packed slabs)
                       emb_ref, mask_ref, w_ref, vec_ref, head_ref,
                       # output (lane-dense slab: logits rows + pooled rows)
                       out_ref):
    f32 = jnp.float32
    mask = mask_ref[...]                                               # (B, S) additive

    # ---- embedding LayerNorm ----
    x = _layernorm(emb_ref[...], vec_ref[0:1, 0:H], vec_ref[1:2, 0:H], eps)

    # ---- transformer layers: static unroll (L=2), everything in registers/VMEM ----
    for l in range(L):
        base = 4 + 8 * l
        wqkv = w_ref[l, 0:H, _OFF_QKV:_OFF_QKV + 3 * H]                # (H, 3H)
        wo = w_ref[l, 0:H, _OFF_WO:_OFF_WO + H]                        # (H, H)
        wi = w_ref[l, 0:H, _OFF_WI:_OFF_WI + FF]                       # (H, FF)
        wo2 = w_ref[l, 0:FF, _OFF_WO2:_OFF_WO2 + H]                    # (FF, H)
        bqkv = vec_ref[base + 0:base + 1, 0:3 * H]
        bo = vec_ref[base + 1:base + 2, 0:H]
        ln1g = vec_ref[base + 2:base + 3, 0:H]
        ln1b = vec_ref[base + 3:base + 4, 0:H]
        bi = vec_ref[base + 4:base + 5, 0:FF]
        bo2 = vec_ref[base + 5:base + 6, 0:H]
        ln2g = vec_ref[base + 6:base + 7, 0:H]
        ln2b = vec_ref[base + 7:base + 8, 0:H]

        # fused QKV projection: one MXU pass of lane width 3H
        qkv = jnp.dot(x, wqkv, preferred_element_type=f32) + bqkv      # (B*S, 3H)
        qkv3 = qkv.reshape(B, S, 3 * H)                                # layout no-op

        # self-attention: batched over B via 3-D einsums; tiny static head loop
        head_ctx = []
        for h in range(nH):
            q = qkv3[:, :, h * D:(h + 1) * D]                          # (B, S, D)
            k = qkv3[:, :, H + h * D:H + (h + 1) * D]
            v = qkv3[:, :, 2 * H + h * D:2 * H + (h + 1) * D]
            s = jnp.einsum("bqd,bkd->bqk", q, k,
                           preferred_element_type=f32) * scale         # (B, S, S)
            s = s + mask[:, None, :]
            s = s - jnp.max(s, axis=-1, keepdims=True)                 # stable softmax
            p = jnp.exp(s)
            p = p * pl.reciprocal(jnp.sum(p, axis=-1, keepdims=True), approx=True)
            head_ctx.append(jnp.einsum("bqk,bkd->bqd", p, v,
                                       preferred_element_type=f32))    # (B, S, D)
        ctx = jnp.concatenate(head_ctx, axis=-1).reshape(B * S, H)     # in registers

        attn_out = jnp.dot(ctx, wo, preferred_element_type=f32) + bo
        x = _layernorm(attn_out + x, ln1g, ln1b, eps)

        inter = _gelu_tanh(jnp.dot(x, wi, preferred_element_type=f32) + bi)
        ffn = jnp.dot(inter, wo2, preferred_element_type=f32) + bo2
        x = _layernorm(ffn + x, ln2g, ln2b, eps)

    # ---- pooler: tanh(W * h_CLS + b); CLS rows gathered in-register ----
    cls = jnp.concatenate([x[b * S:b * S + 1, :] for b in range(B)], axis=0)  # (B, H)
    pooled = jnp.tanh(jnp.dot(cls, head_ref[:, 0:H],
                              preferred_element_type=f32) + vec_ref[2:3, 0:H])

    # dropout(p=0.3): identity in eval mode.
    # TODO(synk): train-mode stochastic dropout via pltpu.prng_random_bits if needed.
    logits = jnp.dot(pooled, head_ref[:, 128:256],
                     preferred_element_type=f32) + vec_ref[3:4, 0:128]        # (B, 128)

    # single unmasked lane-dense store: rows [0,B)=logits, [B,2B)=pooled, rest zero
    pooled_pad = jnp.concatenate([pooled, jnp.zeros((B, 128 - H), f32)], axis=1)
    pieces = [logits, pooled_pad]
    pad_rows = out_ref.shape[0] - 2 * B
    if pad_rows > 0:
        pieces.append(jnp.zeros((pad_rows, 128), f32))
    out_ref[...] = jnp.concatenate(pieces, axis=0)


# ----------------------------- parameter init --------------------------------
def init_params(key, cfg):
    cnt = [0]

    def nk():
        cnt[0] += 1
        return jax.random.fold_in(key, cnt[0])

    def w(shape):
        return 0.02 * jax.random.normal(nk(), shape, dtype=jnp.float32)

    p = {
        "word_emb": w((cfg.vocab_size, cfg.hidden)),
        "pos_emb": w((cfg.max_position, cfg.hidden)),
        "tok_emb": w((cfg.type_vocab_size, cfg.hidden)),
        "emb_ln_g": jnp.ones((cfg.hidden,), jnp.float32),
        "emb_ln_b": jnp.zeros((cfg.hidden,), jnp.float32),
        "layers": [],
        "pool_w": w((cfg.hidden, cfg.hidden)),
        "pool_b": jnp.zeros((cfg.hidden,), jnp.float32),
        "cls_w": w((cfg.hidden, cfg.num_labels)),
        "cls_b": jnp.zeros((cfg.num_labels,), jnp.float32),
    }
    for _ in range(cfg.num_layers):
        p["layers"].append({
            "wq": w((cfg.hidden, cfg.hidden)), "bq": jnp.zeros((cfg.hidden,), jnp.float32),
            "wk": w((cfg.hidden, cfg.hidden)), "bk": jnp.zeros((cfg.hidden,), jnp.float32),
            "wv": w((cfg.hidden, cfg.hidden)), "bv": jnp.zeros((cfg.hidden,), jnp.float32),
            "wo": w((cfg.hidden, cfg.hidden)), "bo": jnp.zeros((cfg.hidden,), jnp.float32),
            "ln1_g": jnp.ones((cfg.hidden,), jnp.float32),
            "ln1_b": jnp.zeros((cfg.hidden,), jnp.float32),
            "wi": w((cfg.hidden, cfg.intermediate)),
            "bi": jnp.zeros((cfg.intermediate,), jnp.float32),
            "wo2": w((cfg.intermediate, cfg.hidden)),
            "bo2": jnp.zeros((cfg.hidden,), jnp.float32),
            "ln2_g": jnp.ones((cfg.hidden,), jnp.float32),
            "ln2_b": jnp.zeros((cfg.hidden,), jnp.float32),
        })
    return p


# ----------------------------- one-time weight packing -----------------------
def pack_params(params, cfg=Cfg):
    """Hoisted out of the forward: build the VMEM-friendly slabs exactly once."""
    H, FF, L = cfg.hidden, cfg.intermediate, cfg.num_layers

    w = jnp.zeros((L, max(H, FF), _W_LANES), jnp.float32)
    vec_rows = 4 + 8 * L
    vec = jnp.zeros((pl.cdiv(vec_rows, 8) * 8, 128), jnp.float32)
    vec = vec.at[0, :H].set(params["emb_ln_g"])
    vec = vec.at[1, :H].set(params["emb_ln_b"])
    vec = vec.at[2, :H].set(params["pool_b"])
    vec = vec.at[3, :cfg.num_labels].set(params["cls_b"])
    for l, lp in enumerate(params["layers"]):
        w = w.at[l, :H, _OFF_QKV:_OFF_QKV + 3 * H].set(
            jnp.concatenate([lp["wq"], lp["wk"], lp["wv"]], axis=1))
        w = w.at[l, :H, _OFF_WO:_OFF_WO + H].set(lp["wo"])
        w = w.at[l, :H, _OFF_WI:_OFF_WI + FF].set(lp["wi"])
        w = w.at[l, :FF, _OFF_WO2:_OFF_WO2 + H].set(lp["wo2"])
        base = 4 + 8 * l
        vec = vec.at[base + 0, :3 * H].set(
            jnp.concatenate([lp["bq"], lp["bk"], lp["bv"]]))
        vec = vec.at[base + 1, :H].set(lp["bo"])
        vec = vec.at[base + 2, :H].set(lp["ln1_g"])
        vec = vec.at[base + 3, :H].set(lp["ln1_b"])
        vec = vec.at[base + 4, :FF].set(lp["bi"])
        vec = vec.at[base + 5, :H].set(lp["bo2"])
        vec = vec.at[base + 6, :H].set(lp["ln2_g"])
        vec = vec.at[base + 7, :H].set(lp["ln2_b"])

    head = jnp.zeros((H, 256), jnp.float32)
    head = head.at[:, :H].set(params["pool_w"])
    head = head.at[:, 128:128 + cfg.num_labels].set(params["cls_w"])

    return {
        "w": w, "vec": vec, "head": head,
        "word_emb": params["word_emb"],
        "pos_emb": params["pos_emb"],
        "tok_emb": params["tok_emb"],
    }


# ----------------------------- model forward ---------------------------------
def _full_spec(shape):
    nd = len(shape)
    return pl.BlockSpec(shape, lambda i, _nd=nd: (0,) * _nd)


@jax.jit
def _forward(packed, input_ids, attention_mask, token_type_ids):
    cfg = Cfg
    B, S = input_ids.shape
    H, nH, D = cfg.hidden, cfg.num_heads, cfg.head_dim
    FF, L = cfg.intermediate, cfg.num_layers

    # embeddings + additive mask (plain-JAX glue, fused under this jit)
    # TODO(synk): could move gathers into the kernel via PrefetchScalarGridSpec
    # with the (tiny) embedding tables resident in VMEM.
    emb = (jnp.take(packed["word_emb"], input_ids, axis=0)
           + packed["pos_emb"][None, :S, :]
           + jnp.take(packed["tok_emb"], token_type_ids, axis=0)
           ).reshape(B * S, H).astype(jnp.float32)
    mask = (1.0 - attention_mask.astype(jnp.float32)) * -10000.0       # (B, S)

    out_rows = max(8, pl.cdiv(2 * B, 8) * 8)
    kernel = functools.partial(_fused_bert_kernel, B, S, H, nH, D, FF, L,
                               cfg.ln_eps, 1.0 / (D ** 0.5))
    inputs = (emb, mask, packed["w"], packed["vec"], packed["head"])

    out = pl.pallas_call(
        kernel,
        out_shape=jax.ShapeDtypeStruct((out_rows, 128), jnp.float32),
        grid=(1,),
        in_specs=[_full_spec(a.shape) for a in inputs],
        out_specs=pl.BlockSpec((out_rows, 128), lambda i: (0, 0)),
        compiler_params=pltpu.CompilerParams(dimension_semantics=("arbitrary",)),
    )(*inputs)

    logits = out[:B, :cfg.num_labels]
    pooled = out[B:2 * B, :H]
    return logits, pooled


def bert_for_user_classification(packed, input_ids, attention_mask,
                                 token_type_ids=None, return_embeddings=False):
    if token_type_ids is None:
        token_type_ids = jnp.zeros_like(input_ids)
    logits, pooled = _forward(packed, input_ids, attention_mask, token_type_ids)
    return pooled if return_embeddings else logits


# ----------------------------- main ------------------------------------------
if __name__ == "__main__":
    key = jax.random.PRNGKey(0)
    cfg = Cfg

    B, S = 2, 8
    k_ids, k_par = jax.random.split(key)
    input_ids = jax.random.randint(k_ids, (B, S), 0, cfg.vocab_size, dtype=jnp.int32)
    attention_mask = jnp.array(
        [[1, 1, 1, 1, 1, 1, 1, 1],
         [1, 1, 1, 1, 1, 1, 0, 0]], dtype=jnp.int32)
    token_type_ids = jnp.zeros((B, S), dtype=jnp.int32)

    params = init_params(k_par, cfg)
    packed = pack_params(params, cfg)        # one-time weight packing (hoisted)

    logits = bert_for_user_classification(packed, input_ids, attention_mask,
                                          token_type_ids)
    logits = jax.block_until_ready(logits)
    assert logits.shape == (B, cfg.num_labels)
    assert bool(jnp.all(jnp.isfinite(logits)))

    pooled = bert_for_user_classification(packed, input_ids, attention_mask,
                                          token_type_ids, return_embeddings=True)
    pooled = jax.block_until_ready(pooled)
    assert pooled.shape == (B, cfg.hidden)
    assert bool(jnp.all(jnp.isfinite(pooled)))

    print("KERNEL_OK")
</pallas_src>

<mosaic_0001>
module attributes {stable_mosaic.version = 11 : i64} {
  func.func @_fused_bert_kernel(%arg0: i32, %arg1: memref<16x32xf32, #tpu.memory_space<vmem>>, %arg2: memref<2x8xf32, #tpu.memory_space<vmem>>, %arg3: memref<2x64x512xf32, #tpu.memory_space<vmem>>, %arg4: memref<24x128xf32, #tpu.memory_space<vmem>>, %arg5: memref<32x256xf32, #tpu.memory_space<vmem>>, %arg6: memref<8x128xf32, #tpu.memory_space<vmem>>) attributes {dimension_semantics = [#tpu.dimension_semantics<arbitrary>], iteration_bounds = array<i64: 1>, scalar_prefetch = 0 : i64, scratch_operands = 0 : i64, tpu.core_type = #tpu.core_type<tc>, window_params = [{pipeline_mode = #tpu.pipeline_mode<synchronous>, transform_indices = @transform_0, window_bounds = array<i64: 16, 32>}, {pipeline_mode = #tpu.pipeline_mode<synchronous>, transform_indices = @transform_1, window_bounds = array<i64: 2, 8>}, {pipeline_mode = #tpu.pipeline_mode<synchronous>, transform_indices = @transform_2, window_bounds = array<i64: 2, 64, 512>}, {pipeline_mode = #tpu.pipeline_mode<synchronous>, transform_indices = @transform_3, window_bounds = array<i64: 24, 128>}, {pipeline_mode = #tpu.pipeline_mode<synchronous>, transform_indices = @transform_4, window_bounds = array<i64: 32, 256>}, {pipeline_mode = #tpu.pipeline_mode<synchronous>, transform_indices = @transform_5, window_bounds = array<i64: 8, 128>}]} {
    %c0 = arith.constant 0 : index
    %c0_0 = arith.constant 0 : index
    %0 = vector.load %arg2[%c0, %c0_0] : memref<2x8xf32, #tpu.memory_space<vmem>>, vector<2x8xf32>
    %c0_1 = arith.constant 0 : index
    %c0_2 = arith.constant 0 : index
    %1 = vector.load %arg1[%c0_1, %c0_2] : memref<16x32xf32, #tpu.memory_space<vmem>>, vector<16x32xf32>
    %c0_3 = arith.constant 0 : index
    %c0_4 = arith.constant 0 : index
    %2 = vector.load %arg4[%c0_3, %c0_4] : memref<24x128xf32, #tpu.memory_space<vmem>>, vector<1x32xf32>
    %c1 = arith.constant 1 : index
    %c0_5 = arith.constant 0 : index
    %3 = vector.load %arg4[%c1, %c0_5] : memref<24x128xf32, #tpu.memory_space<vmem>>, vector<1x32xf32>
    %cst = arith.constant dense<0.000000e+00> : vector<16xf32>
    %4 = vector.multi_reduction <add>, %1, %cst [1] : vector<16x32xf32> to vector<16xf32>
    %5 = vector.shape_cast %4 : vector<16xf32> to vector<16x1xf32>
    %cst_6 = arith.constant 3.200000e+01 : f32
    %6 = vector.broadcast %cst_6 : f32 to vector<16x1xf32>
    %7 = arith.divf %5, %6 : vector<16x1xf32>
    %8 = vector.broadcast %7 : vector<16x1xf32> to vector<16x32xf32>
    %9 = arith.subf %1, %8 : vector<16x32xf32>
    %10 = arith.mulf %9, %9 : vector<16x32xf32>
    %cst_7 = arith.constant dense<0.000000e+00> : vector<16xf32>
    %11 = vector.multi_reduction <add>, %10, %cst_7 [1] : vector<16x32xf32> to vector<16xf32>
    %12 = vector.shape_cast %11 : vector<16xf32> to vector<16x1xf32>
    %cst_8 = arith.constant 3.200000e+01 : f32
    %13 = vector.broadcast %cst_8 : f32 to vector<16x1xf32>
    %14 = arith.divf %12, %13 : vector<16x1xf32>
    %cst_9 = arith.constant 9.99999996E-13 : f32
    %15 = vector.broadcast %cst_9 : f32 to vector<16x1xf32>
    %16 = arith.addf %14, %15 : vector<16x1xf32>
    %17 = math.rsqrt %16 : vector<16x1xf32>
    %18 = vector.broadcast %17 : vector<16x1xf32> to vector<16x32xf32>
    %19 = arith.mulf %9, %18 : vector<16x32xf32>
    %20 = vector.broadcast %2 : vector<1x32xf32> to vector<16x32xf32>
    %21 = arith.mulf %19, %20 : vector<16x32xf32>
    %22 = vector.broadcast %3 : vector<1x32xf32> to vector<16x32xf32>
    %23 = arith.addf %21, %22 : vector<16x32xf32>
    %c0_10 = arith.constant 0 : index
    %c0_11 = arith.constant 0 : index
    %c0_12 = arith.constant 0 : index
    %24 = vector.load %arg3[%c0_10, %c0_11, %c0_12] : memref<2x64x512xf32, #tpu.memory_space<vmem>>, vector<1x32x96xf32>
    %25 = vector.shape_cast %24 : vector<1x32x96xf32> to vector<32x96xf32>
    %c0_13 = arith.constant 0 : index
    %c0_14 = arith.constant 0 : index
    %c128 = arith.constant 128 : index
    %26 = vector.load %arg3[%c0_13, %c0_14, %c128] : memref<2x64x512xf32, #tpu.memory_space<vmem>>, vector<1x32x32xf32>
    %27 = vector.shape_cast %26 : vector<1x32x32xf32> to vector<32x32xf32>
    %c0_15 = arith.constant 0 : index
    %c0_16 = arith.constant 0 : index
    %c256 = arith.constant 256 : index
    %28 = vector.load %arg3[%c0_15, %c0_16, %c256] : memref<2x64x512xf32, #tpu.memory_space<vmem>>, vector<1x32x64xf32>
    %29 = vector.shape_cast %28 : vector<1x32x64xf32> to vector<32x64xf32>
    %c0_17 = arith.constant 0 : index
    %c0_18 = arith.constant 0 : index
    %c384 = arith.constant 384 : index
    %30 = vector.load %arg3[%c0_17, %c0_18, %c384] : memref<2x64x512xf32, #tpu.memory_space<vmem>>, vector<1x64x32xf32>
    %31 = vector.shape_cast %30 : vector<1x64x32xf32> to vector<64x32xf32>
    %c4 = arith.constant 4 : index
    %c0_19 = arith.constant 0 : index
    %32 = vector.load %arg4[%c4, %c0_19] : memref<24x128xf32, #tpu.memory_space<vmem>>, vector<1x96xf32>
    %c5 = arith.constant 5 : index
    %c0_20 = arith.constant 0 : index
    %33 = vector.load %arg4[%c5, %c0_20] : memref<24x128xf32, #tpu.memory_space<vmem>>, vector<1x32xf32>
    %c6 = arith.constant 6 : index
    %c0_21 = arith.constant 0 : index
    %34 = vector.load %arg4[%c6, %c0_21] : memref<24x128xf32, #tpu.memory_space<vmem>>, vector<1x32xf32>
    %c7 = arith.constant 7 : index
    %c0_22 = arith.constant 0 : index
    %35 = vector.load %arg4[%c7, %c0_22] : memref<24x128xf32, #tpu.memory_space<vmem>>, vector<1x32xf32>
    %c8 = arith.constant 8 : index
    %c0_23 = arith.constant 0 : index
    %36 = vector.load %arg4[%c8, %c0_23] : memref<24x128xf32, #tpu.memory_space<vmem>>, vector<1x64xf32>
    %c9 = arith.constant 9 : index
    %c0_24 = arith.constant 0 : index
    %37 = vector.load %arg4[%c9, %c0_24] : memref<24x128xf32, #tpu.memory_space<vmem>>, vector<1x32xf32>
    %c10 = arith.constant 10 : index
    %c0_25 = arith.constant 0 : index
    %38 = vector.load %arg4[%c10, %c0_25] : memref<24x128xf32, #tpu.memory_space<vmem>>, vector<1x32xf32>
    %c11 = arith.constant 11 : index
    %c0_26 = arith.constant 0 : index
    %39 = vector.load %arg4[%c11, %c0_26] : memref<24x128xf32, #tpu.memory_space<vmem>>, vector<1x32xf32>
    %cst_27 = arith.constant dense<0.000000e+00> : vector<16x96xf32>
    %40 = tpu.matmul %23, %25, %cst_27 {dimension_numbers = #tpu.dot_dimension_numbers<[1], [0], [0], [1], [0, 0, 1, 1], [], []>} : vector<16x32xf32>, vector<32x96xf32>, vector<16x96xf32> -> vector<16x96xf32>
    %41 = vector.broadcast %32 : vector<1x96xf32> to vector<16x96xf32>
    %42 = arith.addf %40, %41 : vector<16x96xf32>
    %43 = vector.shape_cast %42 : vector<16x96xf32> to vector<2x8x96xf32>
    %44 = vector.extract_strided_slice %43 {offsets = [0, 0, 0], sizes = [2, 8, 16], strides = [1, 1, 1]} : vector<2x8x96xf32> to vector<2x8x16xf32>
    %45 = vector.extract_strided_slice %43 {offsets = [0, 0, 32], sizes = [2, 8, 16], strides = [1, 1, 1]} : vector<2x8x96xf32> to vector<2x8x16xf32>
    %46 = vector.extract_strided_slice %43 {offsets = [0, 0, 64], sizes = [2, 8, 16], strides = [1, 1, 1]} : vector<2x8x96xf32> to vector<2x8x16xf32>
    "tpu.trace_start"() <{level = 10 : i32, message = "bqd,bkd->bqk"}> : () -> ()
    %cst_28 = arith.constant dense<0.000000e+00> : vector<2x8x8xf32>
    %47 = tpu.matmul %44, %45, %cst_28 {dimension_numbers = #tpu.dot_dimension_numbers<[2], [2], [1], [1], [0, 0, 0, 1, 1, 1], [0], [0]>} : vector<2x8x16xf32>, vector<2x8x16xf32>, vector<2x8x8xf32> -> vector<2x8x8xf32>
    "tpu.trace_stop"() : () -> ()
    %cst_29 = arith.constant 2.500000e-01 : f32
    %48 = vector.broadcast %cst_29 : f32 to vector<2x8x8xf32>
    %49 = arith.mulf %47, %48 : vector<2x8x8xf32>
    %50 = vector.shape_cast %0 : vector<2x8xf32> to vector<2x1x8xf32>
    %51 = vector.broadcast %50 : vector<2x1x8xf32> to vector<2x8x8xf32>
    %52 = arith.addf %49, %51 : vector<2x8x8xf32>
    %cst_30 = arith.constant dense<0xFF800000> : vector<2x8xf32>
    %53 = vector.multi_reduction <maximumf>, %52, %cst_30 [2] : vector<2x8x8xf32> to vector<2x8xf32>
    %54 = vector.shape_cast %53 : vector<2x8xf32> to vector<2x8x1xf32>
    %55 = vector.broadcast %54 : vector<2x8x1xf32> to vector<2x8x8xf32>
    %56 = arith.subf %52, %55 : vector<2x8x8xf32>
    %57 = math.exp %56 : vector<2x8x8xf32>
    %cst_31 = arith.constant dense<0.000000e+00> : vector<2x8xf32>
    %58 = vector.multi_reduction <add>, %57, %cst_31 [2] : vector<2x8x8xf32> to vector<2x8xf32>
    %59 = vector.shape_cast %58 : vector<2x8xf32> to vector<2x8x1xf32>
    %60 = tpu.reciprocal %59 {approx = true} : vector<2x8x1xf32> -> vector<2x8x1xf32>
    %61 = vector.broadcast %60 : vector<2x8x1xf32> to vector<2x8x8xf32>
    %62 = arith.mulf %57, %61 : vector<2x8x8xf32>
    "tpu.trace_start"() <{level = 10 : i32, message = "bqk,bkd->bqd"}> : () -> ()
    %cst_32 = arith.constant dense<0.000000e+00> : vector<2x8x16xf32>
    %63 = tpu.matmul %62, %46, %cst_32 {dimension_numbers = #tpu.dot_dimension_numbers<[2], [1], [1], [2], [0, 0, 0, 1, 1, 2], [0], [0]>} : vector<2x8x8xf32>, vector<2x8x16xf32>, vector<2x8x16xf32> -> vector<2x8x16xf32>
    "tpu.trace_stop"() : () -> ()
    %64 = vector.extract_strided_slice %43 {offsets = [0, 0, 16], sizes = [2, 8, 16], strides = [1, 1, 1]} : vector<2x8x96xf32> to vector<2x8x16xf32>
    %65 = vector.extract_strided_slice %43 {offsets = [0, 0, 48], sizes = [2, 8, 16], strides = [1, 1, 1]} : vector<2x8x96xf32> to vector<2x8x16xf32>
    %66 = vector.extract_strided_slice %43 {offsets = [0, 0, 80], sizes = [2, 8, 16], strides = [1, 1, 1]} : vector<2x8x96xf32> to vector<2x8x16xf32>
    "tpu.trace_start"() <{level = 10 : i32, message = "bqd,bkd->bqk"}> : () -> ()
    %cst_33 = arith.constant dense<0.000000e+00> : vector<2x8x8xf32>
    %67 = tpu.matmul %64, %65, %cst_33 {dimension_numbers = #tpu.dot_dimension_numbers<[2], [2], [1], [1], [0, 0, 0, 1, 1, 1], [0], [0]>} : vector<2x8x16xf32>, vector<2x8x16xf32>, vector<2x8x8xf32> -> vector<2x8x8xf32>
    "tpu.trace_stop"() : () -> ()
    %cst_34 = arith.constant 2.500000e-01 : f32
    %68 = vector.broadcast %cst_34 : f32 to vector<2x8x8xf32>
    %69 = arith.mulf %67, %68 : vector<2x8x8xf32>
    %70 = vector.shape_cast %0 : vector<2x8xf32> to vector<2x1x8xf32>
    %71 = vector.broadcast %70 : vector<2x1x8xf32> to vector<2x8x8xf32>
    %72 = arith.addf %69, %71 : vector<2x8x8xf32>
    %cst_35 = arith.constant dense<0xFF800000> : vector<2x8xf32>
    %73 = vector.multi_reduction <maximumf>, %72, %cst_35 [2] : vector<2x8x8xf32> to vector<2x8xf32>
    %74 = vector.shape_cast %73 : vector<2x8xf32> to vector<2x8x1xf32>
    %75 = vector.broadcast %74 : vector<2x8x1xf32> to vector<2x8x8xf32>
    %76 = arith.subf %72, %75 : vector<2x8x8xf32>
    %77 = math.exp %76 : vector<2x8x8xf32>
    %cst_36 = arith.constant dense<0.000000e+00> : vector<2x8xf32>
    %78 = vector.multi_reduction <add>, %77, %cst_36 [2] : vector<2x8x8xf32> to vector<2x8xf32>
    %79 = vector.shape_cast %78 : vector<2x8xf32> to vector<2x8x1xf32>
    %80 = tpu.reciprocal %79 {approx = true} : vector<2x8x1xf32> -> vector<2x8x1xf32>
    %81 = vector.broadcast %80 : vector<2x8x1xf32> to vector<2x8x8xf32>
    %82 = arith.mulf %77, %81 : vector<2x8x8xf32>
    "tpu.trace_start"() <{level = 10 : i32, message = "bqk,bkd->bqd"}> : () -> ()
    %cst_37 = arith.constant dense<0.000000e+00> : vector<2x8x16xf32>
    %83 = tpu.matmul %82, %66, %cst_37 {dimension_numbers = #tpu.dot_dimension_numbers<[2], [1], [1], [2], [0, 0, 0, 1, 1, 2], [0], [0]>} : vector<2x8x8xf32>, vector<2x8x16xf32>, vector<2x8x16xf32> -> vector<2x8x16xf32>
    "tpu.trace_stop"() : () -> ()
    %84 = tpu.concatenate %63, %83 in 2 : vector<2x8x16xf32>, vector<2x8x16xf32> -> vector<2x8x32xf32>
    %85 = vector.shape_cast %84 : vector<2x8x32xf32> to vector<16x32xf32>
    %cst_38 = arith.constant dense<0.000000e+00> : vector<16x32xf32>
    %86 = tpu.matmul %85, %27, %cst_38 {dimension_numbers = #tpu.dot_dimension_numbers<[1], [0], [0], [1], [0, 0, 1, 1], [], []>} : vector<16x32xf32>, vector<32x32xf32>, vector<16x32xf32> -> vector<16x32xf32>
    %87 = vector.broadcast %33 : vector<1x32xf32> to vector<16x32xf32>
    %88 = arith.addf %86, %87 : vector<16x32xf32>
    %89 = arith.addf %88, %23 : vector<16x32xf32>
    %cst_39 = arith.constant dense<0.000000e+00> : vector<16xf32>
    %90 = vector.multi_reduction <add>, %89, %cst_39 [1] : vector<16x32xf32> to vector<16xf32>
    %91 = vector.shape_cast %90 : vector<16xf32> to vector<16x1xf32>
    %cst_40 = arith.constant 3.200000e+01 : f32
    %92 = vector.broadcast %cst_40 : f32 to vector<16x1xf32>
    %93 = arith.divf %91, %92 : vector<16x1xf32>
    %94 = vector.broadcast %93 : vector<16x1xf32> to vector<16x32xf32>
    %95 = arith.subf %89, %94 : vector<16x32xf32>
    %96 = arith.mulf %95, %95 : vector<16x32xf32>
    %cst_41 = arith.constant dense<0.000000e+00> : vector<16xf32>
    %97 = vector.multi_reduction <add>, %96, %cst_41 [1] : vector<16x32xf32> to vector<16xf32>
    %98 = vector.shape_cast %97 : vector<16xf32> to vector<16x1xf32>
    %cst_42 = arith.constant 3.200000e+01 : f32
    %99 = vector.broadcast %cst_42 : f32 to vector<16x1xf32>
    %100 = arith.divf %98, %99 : vector<16x1xf32>
    %cst_43 = arith.constant 9.99999996E-13 : f32
    %101 = vector.broadcast %cst_43 : f32 to vector<16x1xf32>
    %102 = arith.addf %100, %101 : vector<16x1xf32>
    %103 = math.rsqrt %102 : vector<16x1xf32>
    %104 = vector.broadcast %103 : vector<16x1xf32> to vector<16x32xf32>
    %105 = arith.mulf %95, %104 : vector<16x32xf32>
    %106 = vector.broadcast %34 : vector<1x32xf32> to vector<16x32xf32>
    %107 = arith.mulf %105, %106 : vector<16x32xf32>
    %108 = vector.broadcast %35 : vector<1x32xf32> to vector<16x32xf32>
    %109 = arith.addf %107, %108 : vector<16x32xf32>
    %cst_44 = arith.constant dense<0.000000e+00> : vector<16x64xf32>
    %110 = tpu.matmul %109, %29, %cst_44 {dimension_numbers = #tpu.dot_dimension_numbers<[1], [0], [0], [1], [0, 0, 1, 1], [], []>} : vector<16x32xf32>, vector<32x64xf32>, vector<16x64xf32> -> vector<16x64xf32>
    %111 = vector.broadcast %36 : vector<1x64xf32> to vector<16x64xf32>
    %112 = arith.addf %110, %111 : vector<16x64xf32>
    %cst_45 = arith.constant 5.000000e-01 : f32
    %113 = vector.broadcast %cst_45 : f32 to vector<16x64xf32>
    %114 = arith.mulf %113, %112 : vector<16x64xf32>
    %cst_46 = arith.constant 4.471500e-02 : f32
    %115 = vector.broadcast %cst_46 : f32 to vector<16x64xf32>
    %116 = arith.mulf %115, %112 : vector<16x64xf32>
    %117 = arith.mulf %116, %112 : vector<16x64xf32>
    %118 = arith.mulf %117, %112 : vector<16x64xf32>
    %119 = arith.addf %112, %118 : vector<16x64xf32>
    %cst_47 = arith.constant 0.797884583 : f32
    %120 = vector.broadcast %cst_47 : f32 to vector<16x64xf32>
    %121 = arith.mulf %120, %119 : vector<16x64xf32>
    %122 = math.tanh %121 : vector<16x64xf32>
    %cst_48 = arith.constant 1.000000e+00 : f32
    %123 = vector.broadcast %cst_48 : f32 to vector<16x64xf32>
    %124 = arith.addf %123, %122 : vector<16x64xf32>
    %125 = arith.mulf %114, %124 : vector<16x64xf32>
    %cst_49 = arith.constant dense<0.000000e+00> : vector<16x32xf32>
    %126 = tpu.matmul %125, %31, %cst_49 {dimension_numbers = #tpu.dot_dimension_numbers<[1], [0], [0], [1], [0, 0, 1, 1], [], []>} : vector<16x64xf32>, vector<64x32xf32>, vector<16x32xf32> -> vector<16x32xf32>
    %127 = vector.broadcast %37 : vector<1x32xf32> to vector<16x32xf32>
    %128 = arith.addf %126, %127 : vector<16x32xf32>
    %129 = arith.addf %128, %109 : vector<16x32xf32>
    %cst_50 = arith.constant dense<0.000000e+00> : vector<16xf32>
    %130 = vector.multi_reduction <add>, %129, %cst_50 [1] : vector<16x32xf32> to vector<16xf32>
    %131 = vector.shape_cast %130 : vector<16xf32> to vector<16x1xf32>
    %cst_51 = arith.constant 3.200000e+01 : f32
    %132 = vector.broadcast %cst_51 : f32 to vector<16x1xf32>
    %133 = arith.divf %131, %132 : vector<16x1xf32>
    %134 = vector.broadcast %133 : vector<16x1xf32> to vector<16x32xf32>
    %135 = arith.subf %129, %134 : vector<16x32xf32>
    %136 = arith.mulf %135, %135 : vector<16x32xf32>
    %cst_52 = arith.constant dense<0.000000e+00> : vector<16xf32>
    %137 = vector.multi_reduction <add>, %136, %cst_52 [1] : vector<16x32xf32> to vector<16xf32>
    %138 = vector.shape_cast %137 : vector<16xf32> to vector<16x1xf32>
    %cst_53 = arith.constant 3.200000e+01 : f32
    %139 = vector.broadcast %cst_53 : f32 to vector<16x1xf32>
    %140 = arith.divf %138, %139 : vector<16x1xf32>
    %cst_54 = arith.constant 9.99999996E-13 : f32
    %141 = vector.broadcast %cst_54 : f32 to vector<16x1xf32>
    %142 = arith.addf %140, %141 : vector<16x1xf32>
    %143 = math.rsqrt %142 : vector<16x1xf32>
    %144 = vector.broadcast %143 : vector<16x1xf32> to vector<16x32xf32>
    %145 = arith.mulf %135, %144 : vector<16x32xf32>
    %146 = vector.broadcast %38 : vector<1x32xf32> to vector<16x32xf32>
    %147 = arith.mulf %145, %146 : vector<16x32xf32>
    %148 = vector.broadcast %39 : vector<1x32xf32> to vector<16x32xf32>
    %149 = arith.addf %147, %148 : vector<16x32xf32>
    %c1_55 = arith.constant 1 : index
    %c0_56 = arith.constant 0 : index
    %c0_57 = arith.constant 0 : index
    %150 = vector.load %arg3[%c1_55, %c0_56, %c0_57] : memref<2x64x512xf32, #tpu.memory_space<vmem>>, vector<1x32x96xf32>
    %151 = vector.shape_cast %150 : vector<1x32x96xf32> to vector<32x96xf32>
    %c1_58 = arith.constant 1 : index
    %c0_59 = arith.constant 0 : index
    %c128_60 = arith.constant 128 : index
    %152 = vector.load %arg3[%c1_58, %c0_59, %c128_60] : memref<2x64x512xf32, #tpu.memory_space<vmem>>, vector<1x32x32xf32>
    %153 = vector.shape_cast %152 : vector<1x32x32xf32> to vector<32x32xf32>
    %c1_61 = arith.constant 1 : index
    %c0_62 = arith.constant 0 : index
    %c256_63 = arith.constant 256 : index
    %154 = vector.load %arg3[%c1_61, %c0_62, %c256_63] : memref<2x64x512xf32, #tpu.memory_space<vmem>>, vector<1x32x64xf32>
    %155 = vector.shape_cast %154 : vector<1x32x64xf32> to vector<32x64xf32>
    %c1_64 = arith.constant 1 : index
    %c0_65 = arith.constant 0 : index
    %c384_66 = arith.constant 384 : index
    %156 = vector.load %arg3[%c1_64, %c0_65, %c384_66] : memref<2x64x512xf32, #tpu.memory_space<vmem>>, vector<1x64x32xf32>
    %157 = vector.shape_cast %156 : vector<1x64x32xf32> to vector<64x32xf32>
    %c12 = arith.constant 12 : index
    %c0_67 = arith.constant 0 : index
    %158 = vector.load %arg4[%c12, %c0_67] : memref<24x128xf32, #tpu.memory_space<vmem>>, vector<1x96xf32>
    %c13 = arith.constant 13 : index
    %c0_68 = arith.constant 0 : index
    %159 = vector.load %arg4[%c13, %c0_68] : memref<24x128xf32, #tpu.memory_space<vmem>>, vector<1x32xf32>
    %c14 = arith.constant 14 : index
    %c0_69 = arith.constant 0 : index
    %160 = vector.load %arg4[%c14, %c0_69] : memref<24x128xf32, #tpu.memory_space<vmem>>, vector<1x32xf32>
    %c15 = arith.constant 15 : index
    %c0_70 = arith.constant 0 : index
    %161 = vector.load %arg4[%c15, %c0_70] : memref<24x128xf32, #tpu.memory_space<vmem>>, vector<1x32xf32>
    %c16 = arith.constant 16 : index
    %c0_71 = arith.constant 0 : index
    %162 = vector.load %arg4[%c16, %c0_71] : memref<24x128xf32, #tpu.memory_space<vmem>>, vector<1x64xf32>
    %c17 = arith.constant 17 : index
    %c0_72 = arith.constant 0 : index
    %163 = vector.load %arg4[%c17, %c0_72] : memref<24x128xf32, #tpu.memory_space<vmem>>, vector<1x32xf32>
    %c18 = arith.constant 18 : index
    %c0_73 = arith.constant 0 : index
    %164 = vector.load %arg4[%c18, %c0_73] : memref<24x128xf32, #tpu.memory_space<vmem>>, vector<1x32xf32>
    %c19 = arith.constant 19 : index
    %c0_74 = arith.constant 0 : index
    %165 = vector.load %arg4[%c19, %c0_74] : memref<24x128xf32, #tpu.memory_space<vmem>>, vector<1x32xf32>
    %cst_75 = arith.constant dense<0.000000e+00> : vector<16x96xf32>
    %166 = tpu.matmul %149, %151, %cst_75 {dimension_numbers = #tpu.dot_dimension_numbers<[1], [0], [0], [1], [0, 0, 1, 1], [], []>} : vector<16x32xf32>, vector<32x96xf32>, vector<16x96xf32> -> vector<16x96xf32>
    %167 = vector.broadcast %158 : vector<1x96xf32> to vector<16x96xf32>
    %168 = arith.addf %166, %167 : vector<16x96xf32>
    %169 = vector.shape_cast %168 : vector<16x96xf32> to vector<2x8x96xf32>
    %170 = vector.extract_strided_slice %169 {offsets = [0, 0, 0], sizes = [2, 8, 16], strides = [1, 1, 1]} : vector<2x8x96xf32> to vector<2x8x16xf32>
    %171 = vector.extract_strided_slice %169 {offsets = [0, 0, 32], sizes = [2, 8, 16], strides = [1, 1, 1]} : vector<2x8x96xf32> to vector<2x8x16xf32>
    %172 = vector.extract_strided_slice %169 {offsets = [0, 0, 64], sizes = [2, 8, 16], strides = [1, 1, 1]} : vector<2x8x96xf32> to vector<2x8x16xf32>
    "tpu.trace_start"() <{level = 10 : i32, message = "bqd,bkd->bqk"}> : () -> ()
    %cst_76 = arith.constant dense<0.000000e+00> : vector<2x8x8xf32>
    %173 = tpu.matmul %170, %171, %cst_76 {dimension_numbers = #tpu.dot_dimension_numbers<[2], [2], [1], [1], [0, 0, 0, 1, 1, 1], [0], [0]>} : vector<2x8x16xf32>, vector<2x8x16xf32>, vector<2x8x8xf32> -> vector<2x8x8xf32>
    "tpu.trace_stop"() : () -> ()
    %cst_77 = arith.constant 2.500000e-01 : f32
    %174 = vector.broadcast %cst_77 : f32 to vector<2x8x8xf32>
    %175 = arith.mulf %173, %174 : vector<2x8x8xf32>
    %176 = vector.shape_cast %0 : vector<2x8xf32> to vector<2x1x8xf32>
    %177 = vector.broadcast %176 : vector<2x1x8xf32> to vector<2x8x8xf32>
    %178 = arith.addf %175, %177 : vector<2x8x8xf32>
    %cst_78 = arith.constant dense<0xFF800000> : vector<2x8xf32>
    %179 = vector.multi_reduction <maximumf>, %178, %cst_78 [2] : vector<2x8x8xf32> to vector<2x8xf32>
    %180 = vector.shape_cast %179 : vector<2x8xf32> to vector<2x8x1xf32>
    %181 = vector.broadcast %180 : vector<2x8x1xf32> to vector<2x8x8xf32>
    %182 = arith.subf %178, %181 : vector<2x8x8xf32>
    %183 = math.exp %182 : vector<2x8x8xf32>
    %cst_79 = arith.constant dense<0.000000e+00> : vector<2x8xf32>
    %184 = vector.multi_reduction <add>, %183, %cst_79 [2] : vector<2x8x8xf32> to vector<2x8xf32>
    %185 = vector.shape_cast %184 : vector<2x8xf32> to vector<2x8x1xf32>
    %186 = tpu.reciprocal %185 {approx = true} : vector<2x8x1xf32> -> vector<2x8x1xf32>
    %187 = vector.broadcast %186 : vector<2x8x1xf32> to vector<2x8x8xf32>
    %188 = arith.mulf %183, %187 : vector<2x8x8xf32>
    "tpu.trace_start"() <{level = 10 : i32, message = "bqk,bkd->bqd"}> : () -> ()
    %cst_80 = arith.constant dense<0.000000e+00> : vector<2x8x16xf32>
    %189 = tpu.matmul %188, %172, %cst_80 {dimension_numbers = #tpu.dot_dimension_numbers<[2], [1], [1], [2], [0, 0, 0, 1, 1, 2], [0], [0]>} : vector<2x8x8xf32>, vector<2x8x16xf32>, vector<2x8x16xf32> -> vector<2x8x16xf32>
    "tpu.trace_stop"() : () -> ()
    %190 = vector.extract_strided_slice %169 {offsets = [0, 0, 16], sizes = [2, 8, 16], strides = [1, 1, 1]} : vector<2x8x96xf32> to vector<2x8x16xf32>
    %191 = vector.extract_strided_slice %169 {offsets = [0, 0, 48], sizes = [2, 8, 16], strides = [1, 1, 1]} : vector<2x8x96xf32> to vector<2x8x16xf32>
    %192 = vector.extract_strided_slice %169 {offsets = [0, 0, 80], sizes = [2, 8, 16], strides = [1, 1, 1]} : vector<2x8x96xf32> to vector<2x8x16xf32>
    "tpu.trace_start"() <{level = 10 : i32, message = "bqd,bkd->bqk"}> : () -> ()
    %cst_81 = arith.constant dense<0.000000e+00> : vector<2x8x8xf32>
    %193 = tpu.matmul %190, %191, %cst_81 {dimension_numbers = #tpu.dot_dimension_numbers<[2], [2], [1], [1], [0, 0, 0, 1, 1, 1], [0], [0]>} : vector<2x8x16xf32>, vector<2x8x16xf32>, vector<2x8x8xf32> -> vector<2x8x8xf32>
    "tpu.trace_stop"() : () -> ()
    %cst_82 = arith.constant 2.500000e-01 : f32
    %194 = vector.broadcast %cst_82 : f32 to vector<2x8x8xf32>
    %195 = arith.mulf %193, %194 : vector<2x8x8xf32>
    %196 = vector.shape_cast %0 : vector<2x8xf32> to vector<2x1x8xf32>
    %197 = vector.broadcast %196 : vector<2x1x8xf32> to vector<2x8x8xf32>
    %198 = arith.addf %195, %197 : vector<2x8x8xf32>
    %cst_83 = arith.constant dense<0xFF800000> : vector<2x8xf32>
    %199 = vector.multi_reduction <maximumf>, %198, %cst_83 [2] : vector<2x8x8xf32> to vector<2x8xf32>
    %200 = vector.shape_cast %199 : vector<2x8xf32> to vector<2x8x1xf32>
    %201 = vector.broadcast %200 : vector<2x8x1xf32> to vector<2x8x8xf32>
    %202 = arith.subf %198, %201 : vector<2x8x8xf32>
    %203 = math.exp %202 : vector<2x8x8xf32>
    %cst_84 = arith.constant dense<0.000000e+00> : vector<2x8xf32>
    %204 = vector.multi_reduction <add>, %203, %cst_84 [2] : vector<2x8x8xf32> to vector<2x8xf32>
    %205 = vector.shape_cast %204 : vector<2x8xf32> to vector<2x8x1xf32>
    %206 = tpu.reciprocal %205 {approx = true} : vector<2x8x1xf32> -> vector<2x8x1xf32>
    %207 = vector.broadcast %206 : vector<2x8x1xf32> to vector<2x8x8xf32>
    %208 = arith.mulf %203, %207 : vector<2x8x8xf32>
    "tpu.trace_start"() <{level = 10 : i32, message = "bqk,bkd->bqd"}> : () -> ()
    %cst_85 = arith.constant dense<0.000000e+00> : vector<2x8x16xf32>
    %209 = tpu.matmul %208, %192, %cst_85 {dimension_numbers = #tpu.dot_dimension_numbers<[2], [1], [1], [2], [0, 0, 0, 1, 1, 2], [0], [0]>} : vector<2x8x8xf32>, vector<2x8x16xf32>, vector<2x8x16xf32> -> vector<2x8x16xf32>
    "tpu.trace_stop"() : () -> ()
    %210 = tpu.concatenate %189, %209 in 2 : vector<2x8x16xf32>, vector<2x8x16xf32> -> vector<2x8x32xf32>
    %211 = vector.shape_cast %210 : vector<2x8x32xf32> to vector<16x32xf32>
    %cst_86 = arith.constant dense<0.000000e+00> : vector<16x32xf32>
    %212 = tpu.matmul %211, %153, %cst_86 {dimension_numbers = #tpu.dot_dimension_numbers<[1], [0], [0], [1], [0, 0, 1, 1], [], []>} : vector<16x32xf32>, vector<32x32xf32>, vector<16x32xf32> -> vector<16x32xf32>
    %213 = vector.broadcast %159 : vector<1x32xf32> to vector<16x32xf32>
    %214 = arith.addf %212, %213 : vector<16x32xf32>
    %215 = arith.addf %214, %149 : vector<16x32xf32>
    %cst_87 = arith.constant dense<0.000000e+00> : vector<16xf32>
    %216 = vector.multi_reduction <add>, %215, %cst_87 [1] : vector<16x32xf32> to vector<16xf32>
    %217 = vector.shape_cast %216 : vector<16xf32> to vector<16x1xf32>
    %cst_88 = arith.constant 3.200000e+01 : f32
    %218 = vector.broadcast %cst_88 : f32 to vector<16x1xf32>
    %219 = arith.divf %217, %218 : vector<16x1xf32>
    %220 = vector.broadcast %219 : vector<16x1xf32> to vector<16x32xf32>
    %221 = arith.subf %215, %220 : vector<16x32xf32>
    %222 = arith.mulf %221, %221 : vector<16x32xf32>
    %cst_89 = arith.constant dense<0.000000e+00> : vector<16xf32>
    %223 = vector.multi_reduction <add>, %222, %cst_89 [1] : vector<16x32xf32> to vector<16xf32>
    %224 = vector.shape_cast %223 : vector<16xf32> to vector<16x1xf32>
    %cst_90 = arith.constant 3.200000e+01 : f32
    %225 = vector.broadcast %cst_90 : f32 to vector<16x1xf32>
    %226 = arith.divf %224, %225 : vector<16x1xf32>
    %cst_91 = arith.constant 9.99999996E-13 : f32
    %227 = vector.broadcast %cst_91 : f32 to vector<16x1xf32>
    %228 = arith.addf %226, %227 : vector<16x1xf32>
    %229 = math.rsqrt %228 : vector<16x1xf32>
    %230 = vector.broadcast %229 : vector<16x1xf32> to vector<16x32xf32>
    %231 = arith.mulf %221, %230 : vector<16x32xf32>
    %232 = vector.broadcast %160 : vector<1x32xf32> to vector<16x32xf32>
    %233 = arith.mulf %231, %232 : vector<16x32xf32>
    %234 = vector.broadcast %161 : vector<1x32xf32> to vector<16x32xf32>
    %235 = arith.addf %233, %234 : vector<16x32xf32>
    %cst_92 = arith.constant dense<0.000000e+00> : vector<16x64xf32>
    %236 = tpu.matmul %235, %155, %cst_92 {dimension_numbers = #tpu.dot_dimension_numbers<[1], [0], [0], [1], [0, 0, 1, 1], [], []>} : vector<16x32xf32>, vector<32x64xf32>, vector<16x64xf32> -> vector<16x64xf32>
    %237 = vector.broadcast %162 : vector<1x64xf32> to vector<16x64xf32>
    %238 = arith.addf %236, %237 : vector<16x64xf32>
    %cst_93 = arith.constant 5.000000e-01 : f32
    %239 = vector.broadcast %cst_93 : f32 to vector<16x64xf32>
    %240 = arith.mulf %239, %238 : vector<16x64xf32>
    %cst_94 = arith.constant 4.471500e-02 : f32
    %241 = vector.broadcast %cst_94 : f32 to vector<16x64xf32>
    %242 = arith.mulf %241, %238 : vector<16x64xf32>
    %243 = arith.mulf %242, %238 : vector<16x64xf32>
    %244 = arith.mulf %243, %238 : vector<16x64xf32>
    %245 = arith.addf %238, %244 : vector<16x64xf32>
    %cst_95 = arith.constant 0.797884583 : f32
    %246 = vector.broadcast %cst_95 : f32 to vector<16x64xf32>
    %247 = arith.mulf %246, %245 : vector<16x64xf32>
    %248 = math.tanh %247 : vector<16x64xf32>
    %cst_96 = arith.constant 1.000000e+00 : f32
    %249 = vector.broadcast %cst_96 : f32 to vector<16x64xf32>
    %250 = arith.addf %249, %248 : vector<16x64xf32>
    %251 = arith.mulf %240, %250 : vector<16x64xf32>
    %cst_97 = arith.constant dense<0.000000e+00> : vector<16x32xf32>
    %252 = tpu.matmul %251, %157, %cst_97 {dimension_numbers = #tpu.dot_dimension_numbers<[1], [0], [0], [1], [0, 0, 1, 1], [], []>} : vector<16x64xf32>, vector<64x32xf32>, vector<16x32xf32> -> vector<16x32xf32>
    %253 = vector.broadcast %163 : vector<1x32xf32> to vector<16x32xf32>
    %254 = arith.addf %252, %253 : vector<16x32xf32>
    %255 = arith.addf %254, %235 : vector<16x32xf32>
    %cst_98 = arith.constant dense<0.000000e+00> : vector<16xf32>
    %256 = vector.multi_reduction <add>, %255, %cst_98 [1] : vector<16x32xf32> to vector<16xf32>
    %257 = vector.shape_cast %256 : vector<16xf32> to vector<16x1xf32>
    %cst_99 = arith.constant 3.200000e+01 : f32
    %258 = vector.broadcast %cst_99 : f32 to vector<16x1xf32>
    %259 = arith.divf %257, %258 : vector<16x1xf32>
    %260 = vector.broadcast %259 : vector<16x1xf32> to vector<16x32xf32>
    %261 = arith.subf %255, %260 : vector<16x32xf32>
    %262 = arith.mulf %261, %261 : vector<16x32xf32>
    %cst_100 = arith.constant dense<0.000000e+00> : vector<16xf32>
    %263 = vector.multi_reduction <add>, %262, %cst_100 [1] : vector<16x32xf32> to vector<16xf32>
    %264 = vector.shape_cast %263 : vector<16xf32> to vector<16x1xf32>
    %cst_101 = arith.constant 3.200000e+01 : f32
    %265 = vector.broadcast %cst_101 : f32 to vector<16x1xf32>
    %266 = arith.divf %264, %265 : vector<16x1xf32>
    %cst_102 = arith.constant 9.99999996E-13 : f32
    %267 = vector.broadcast %cst_102 : f32 to vector<16x1xf32>
    %268 = arith.addf %266, %267 : vector<16x1xf32>
    %269 = math.rsqrt %268 : vector<16x1xf32>
    %270 = vector.broadcast %269 : vector<16x1xf32> to vector<16x32xf32>
    %271 = arith.mulf %261, %270 : vector<16x32xf32>
    %272 = vector.broadcast %164 : vector<1x32xf32> to vector<16x32xf32>
    %273 = arith.mulf %271, %272 : vector<16x32xf32>
    %274 = vector.broadcast %165 : vector<1x32xf32> to vector<16x32xf32>
    %275 = arith.addf %273, %274 : vector<16x32xf32>
    %276 = vector.extract_strided_slice %275 {offsets = [0, 0], sizes = [1, 32], strides = [1, 1]} : vector<16x32xf32> to vector<1x32xf32>
    %277 = vector.extract_strided_slice %275 {offsets = [8, 0], sizes = [1, 32], strides = [1, 1]} : vector<16x32xf32> to vector<1x32xf32>
    %278 = tpu.concatenate %276, %277 in 0 : vector<1x32xf32>, vector<1x32xf32> -> vector<2x32xf32>
    %c0_103 = arith.constant 0 : index
    %c0_104 = arith.constant 0 : index
    %279 = vector.load %arg5[%c0_103, %c0_104] : memref<32x256xf32, #tpu.memory_space<vmem>>, vector<32x32xf32>
    %cst_105 = arith.constant dense<0.000000e+00> : vector<2x32xf32>
    %280 = tpu.matmul %278, %279, %cst_105 {dimension_numbers = #tpu.dot_dimension_numbers<[1], [0], [0], [1], [0, 0, 1, 1], [], []>} : vector<2x32xf32>, vector<32x32xf32>, vector<2x32xf32> -> vector<2x32xf32>
    %c2 = arith.constant 2 : index
    %c0_106 = arith.constant 0 : index
    %281 = vector.load %arg4[%c2, %c0_106] : memref<24x128xf32, #tpu.memory_space<vmem>>, vector<1x32xf32>
    %282 = vector.broadcast %281 : vector<1x32xf32> to vector<2x32xf32>
    %283 = arith.addf %280, %282 : vector<2x32xf32>
    %284 = math.tanh %283 : vector<2x32xf32>
    %c0_107 = arith.constant 0 : index
    %c128_108 = arith.constant 128 : index
    %285 = vector.load %arg5[%c0_107, %c128_108] : memref<32x256xf32, #tpu.memory_space<vmem>>, vector<32x128xf32>
    %cst_109 = arith.constant dense<0.000000e+00> : vector<2x128xf32>
    %286 = tpu.matmul %284, %285, %cst_109 {dimension_numbers = #tpu.dot_dimension_numbers<[1], [0], [0], [1], [0, 0, 1, 1], [], []>} : vector<2x32xf32>, vector<32x128xf32>, vector<2x128xf32> -> vector<2x128xf32>
    %c3 = arith.constant 3 : index
    %c0_110 = arith.constant 0 : index
    %287 = vector.load %arg4[%c3, %c0_110] : memref<24x128xf32, #tpu.memory_space<vmem>>, vector<1x128xf32>
    %288 = vector.broadcast %287 : vector<1x128xf32> to vector<2x128xf32>
    %289 = arith.addf %286, %288 : vector<2x128xf32>
    %cst_111 = arith.constant 0.000000e+00 : f32
    %290 = vector.broadcast %cst_111 : f32 to vector<2x96xf32>
    %291 = tpu.concatenate %284, %290 in 1 : vector<2x32xf32>, vector<2x96xf32> -> vector<2x128xf32>
    %cst_112 = arith.constant 0.000000e+00 : f32
    %292 = vector.broadcast %cst_112 : f32 to vector<4x128xf32>
    %293 = tpu.concatenate %289, %291, %292 in 0 : vector<2x128xf32>, vector<2x128xf32>, vector<4x128xf32> -> vector<8x128xf32>
    %c0_113 = arith.constant 0 : index
    %c0_114 = arith.constant 0 : index
    %294 = vector.load %arg6[%c0_113, %c0_114] : memref<8x128xf32, #tpu.memory_space<vmem>>, vector<8x128xf32>
    tpu.vector_store %arg6[%c0_113, %c0_114], %293 {strides = array<i32>} : memref<8x128xf32, #tpu.memory_space<vmem>>, vector<8x128xf32>,
    return
  }
  func.func @transform_0(%arg0: i32) -> (i32, i32) {
    %c0_i32 = arith.constant 0 : i32
    %c0_i32_0 = arith.constant 0 : i32
    %c0_i32_1 = arith.constant 0 : i32
    return %c0_i32, %c0_i32_0 : i32, i32
  }
  func.func @transform_1(%arg0: i32) -> (i32, i32) {
    %c0_i32 = arith.constant 0 : i32
    %c0_i32_0 = arith.constant 0 : i32
    %c0_i32_1 = arith.constant 0 : i32
    return %c0_i32, %c0_i32_0 : i32, i32
  }
  func.func @transform_2(%arg0: i32) -> (i32, i32, i32) {
    %c0_i32 = arith.constant 0 : i32
    %c0_i32_0 = arith.constant 0 : i32
    %c0_i32_1 = arith.constant 0 : i32
    %c0_i32_2 = arith.constant 0 : i32
    return %c0_i32, %c0_i32_0, %c0_i32_1 : i32, i32, i32
  }
  func.func @transform_3(%arg0: i32) -> (i32, i32) {
    %c0_i32 = arith.constant 0 : i32
    %c0_i32_0 = arith.constant 0 : i32
    %c0_i32_1 = arith.constant 0 : i32
    return %c0_i32, %c0_i32_0 : i32, i32
  }
  func.func @transform_4(%arg0: i32) -> (i32, i32) {
    %c0_i32 = arith.constant 0 : i32
    %c0_i32_0 = arith.constant 0 : i32
    %c0_i32_1 = arith.constant 0 : i32
    return %c0_i32, %c0_i32_0 : i32, i32
  }
  func.func @transform_5(%arg0: i32) -> (i32, i32) {
    %c0_i32 = arith.constant 0 : i32
    %c0_i32_0 = arith.constant 0 : i32
    %c0_i32_1 = arith.constant 0 : i32
    return %c0_i32, %c0_i32_0 : i32, i32
  }
}

</mosaic_0001>

<bundles_post_ra>
// kernel: _forward.1
= control target key start
LH: loop header
LB: loop body
LE: loop exit
PB: predicated region body
PF: predicated region fallthrough
CT: control target
= control target key end

     0   :  { %10 = vsyncpa [#allocation3], 0  ;;  %s3047_s18 = smov [#allocation2]   ;;  %s3435_s0 = inlined_call_operand.vmem [shape: f32[16,32], index: 0, kind: input, shape index: {}]   ;;  %s3436_s1 = inlined_call_operand.vmem [shape: f32[2,8], index: 1, kind: input, shape index: {}]   ;;  %s3437_s2 = inlined_call_operand.hbm [shape: f32[2,64,512], index: 2, kind: input, shape index: {}]   ;;  %s3438_s3 = inlined_call_operand.vmem [shape: f32[24,128], index: 3, kind: input, shape index: {}]   ;;  %s3439_s4 = inlined_call_operand.vmem [shape: f32[32,256], index: 4, kind: input, shape index: {}]   ;;  %s3440_s5 = inlined_call_operand.vmem [shape: f32[8,128], index: 5, kind: output, shape index: {}]  }
   0x1   :  { %s20_s19 = sshll.u32 %s3047_s18, 4  ;;  %s21_s19 = int_to_ptr.vmem [resolvable:$true] %s20_s19 }
   0x2   :  { %s3033_s20 = scalar_lea.vmem %s21_s19, 8192  ;;  %p3038_p1 = scmp.lt.s32.totalorder %s21_s19, %s21_s19 }
   0x3   :  { %p3034_p0 = scmp.ne.s32.totalorder %s21_s19, %s3033_s20  ;;  %p3039_p2 = scmp.lt.s32.totalorder %s3033_s20, %s3033_s20 }
   0x5   :  { %p3040_p3 = por %p3039_p2, %p3038_p1 }
   0x7   :  { %p3041_p4 = pnand %p3040_p3, %p3034_p0 }
   0x9   :  { %3044 = shalt.err (!%p3041_p4)
}
   0xa   :  { %s3048_s21 = smov 512   ;;  %s3049_s22 = smov 32  }
   0xb   :  { %26 = dma.hbm_to_vmem [thread:$0]  %s3437_s2, 8192, %s21_s19, [#allocation3], %s3048_s21, %s3048_s21, %s3049_s22  }
   0xc   :  { %3045 = dma.done.wait [#allocation3], 8192  }
   0xd   :  { %3046 = vsyncadd [#allocation3], 4294959104  ;;  %vm39_vm0 = vcmask 261120   ;;  %v35_v0 = vld [vmem:[%s3435_s0] sm:$0xff]  ;;  %v36_v1 = vld [vmem:[%s3435_s0 + $0x8] sm:$0xff]  ;;  %v3050_v34 = vmov 0.0   ;;  %v361_v44 = vlaneseq }
   0xe   :  { %v40_v2 = vsel %vm39_vm0, %v35_v0, 0.0  ;;  %v43_v3 = vsel %vm39_vm0, %v36_v1, 0.0  ;;  %v82_v14 = vld [vmem:[#allocation2 + $0x60] sm:$0xff]  ;;  %2756 = vmatprep.subr.mxu1 %v3050_v34  ;;  %vm3051_vm1 = vmmov 0   ;;  %s3052_s8 = smov 96   ;;  %vm195_vm2 = vcmask 130048  }
   0xf   :  { %41 = vadd.xlane.f32.xlu0 %v40_v2  ;;  %v81_v15 = vld [vmem:[#allocation2 + $0x40] sm:$0xff]  ;;  %2745 = vmatprep.subr.mxu0 %v82_v14  ;;  %v3053_v42 = vmov 1966171168   ;;  %v362_v46 = vshrl.u32 %v361_v44, 7  ;;  %vm384_vm3 = vcmask 64512   ;;  %s3055_s11 = smov 80  }
  0x10   :  { %2746 = vmatpush3.msra.mxu0 %v82_v14  ;;  %v80_v16 = vld [vmem:[#allocation2 + $0x20] sm:$0xff]  ;;  %2758 = vmatprep.mubr.msk.f32.mxu1 %vm3051_vm1, %v3050_v34  ;;  %v359_v43 = vunpack.c.l.s4 %v3053_v42  ;;  %s3056_s12 = smov 112   ;;  %s3057_s13 = smov 48   ;;  %vm1135_vm4 = vcmask 523264   ;;  %vm2403_vm5 = vcmask 1040384   ;;  %vm2574_vm6 = vcmask 1041408  }
  0x11   :  { %2747 = vmatprep.subr.mxu0 %v81_v15  ;;  %v79_v17 = vld [vmem:[#allocation2] sm:$0xff]  ;;  %v374_v50 = vsub.s32 0, %v362_v46  ;;  %s3058_s14 = smov 16   ;;  %vm2576_vm7 = vcmask 1043456  }
  0x12   :  { %2748 = vmatpush3.msra.mxu0 %v81_v15  ;;  %v2584_v25 = vld [vmem:[%s3438_s3] ss:$0 sm:$0xff]  ;;  %v2585_v27 = vld [vmem:[%s3438_s3 + $0x1] ss:$0 sm:$0xff]  ;;  %v2586_v35 = vld [vmem:[%s3438_s3 + $0x4] ss:$0 sm:$0xff]  ;;  %v360_v45 = vunpack.c.0.s8 %v359_v43 }
  0x13   :  { %44 = vadd.xlane.f32.xlu0 %v43_v3  ;;  %2749 = vmatprep.subr.mxu0 %v80_v16  ;;  %v2593_v48 = vld.sshfl [vmem:[%s3436_s1] sm:$0x11 pattern:$0x75316420]  ;;  %s3054_s1 = smov 64  }
  0x14   :  { %2750 = vmatpush3.msra.mxu0 %v80_v16  ;;  %v363_v47 = vsub.s32 %v360_v45, %v362_v46  ;;  %v357_v51 = vcombine.high %v2593_v48, %v2593_v48 }
  0x15   :  { %2751 = vmatprep.subr.mxu0 %v79_v17 }
  0x16   :  { %2752 = vmatpush3.msra.mxu0 %v79_v17  ;;  %v364_v49 = vrot.slane %v2593_v48, %v363_v47  ;;  %v371_v53 = vrot.slane %v357_v51, %v363_v47 }
  0x17   :  { %2766 = vmatprep.subr.mxu0 %v3050_v34 }
  0x18   :  { %v3148_v52 = vrot.slane %v364_v49, %v374_v50  ;;  %v3151_v58 = vrot.slane %v371_v53, %v374_v50 }
  0x98   :  { %v42_v4 = vpop.xlane.xlu0 %41 }
  0x99   :  { %v47_v5 = vmul.f32 0.03125, %v42_v4 }
  0x9b   :  { %v49_v6 = vsub.f32 %v35_v0, %v47_v5 }
  0x9c   :  { %v45_v7 = vpop.xlane.xlu0 %44 }
  0x9d   :  { %v48_v8 = vmul.f32 0.03125, %v45_v7  ;;  %v51_v9 = vmul.f32 %v49_v6, %v49_v6 }
  0x9f   :  { %v50_v10 = vsub.f32 %v36_v1, %v48_v8  ;;  %v53_v11 = vsel %vm39_vm0, %v51_v9, 0.0 }
  0xa0   :  { %54 = vadd.xlane.f32.xlu1 %v53_v11 }
  0xa1   :  { %v52_v12 = vmul.f32 %v50_v10, %v50_v10 }
  0xa3   :  { %v56_v13 = vsel %vm39_vm0, %v52_v12, 0.0 }
  0xa4   :  { %57 = vadd.xlane.f32.xlu1 %v56_v13 }
 0x129   :  { %v55_v18 = vpop.xlane.xlu1 %54 }
 0x12a   :  { %v59_v19 = vmul.f32 0.03125, %v55_v18 }
 0x12c   :  { %v61_v20 = vadd.f32 1e-12, %v59_v19 }
 0x12d   :  { %v58_v21 = vpop.xlane.xlu1 %57 }
 0x12e   :  { %2963 = vrsqrt.f32 %v61_v20  ;;  %v60_v22 = vmul.f32 0.03125, %v58_v21 }
 0x130   :  { %v62_v23 = vadd.f32 1e-12, %v60_v22 }
 0x132   :  { %2965 = vrsqrt.f32 %v62_v23 }
 0x13b   :  { %v2964_v24 = vpop.eup %2963 }
 0x13c   :  { %v65_v26 = vmul.f32 %v2964_v24, %v49_v6 }
 0x13e   :  { %v71_v28 = vmul.f32 %v2584_v25, %v65_v26 }
 0x13f   :  { %v2966_v29 = vpop.eup %2965 }
 0x140   :  { %v66_v30 = vmul.f32 %v2966_v29, %v50_v10  ;;  %v3108_v31 = vadd.f32 %v2585_v27, %v71_v28 }
 0x142   :  { %v72_v32 = vmul.f32 %v2584_v25, %v66_v30  ;;  %2753 = vmatprep.mubr.msk.f32.mxu0 %vm39_vm0, %v3108_v31 }
 0x144   :  { %v3112_v33 = vadd.f32 %v2585_v27, %v72_v32 }
 0x146   :  { %2754 = vmatmul.mubr.msk.f32.vlgmr.msra.gmra.mxu0 %vm39_vm0, %v3112_v33 }
 0x147   :  { %2768 = vmatprep.mubr.msk.f32.mxu0 %vm3051_vm1, %v3050_v34 }
 0x206   :  { %v2755_v36 = vpop.f32.mrf.mxu0 }
 0x207   :  { %v3125_v37 = vadd.f32 %v2755_v36, %v2586_v35 }
 0x208   :  { %v183_v38 = vpop.f32.mrf.mxu0 }
 0x209   :  { %v3127_v39 = vadd.f32 %v2586_v35, %v183_v38  ;;  %271 = vrot.lane.b32.xlu1 %v3125_v37, %s3052_s8 }
 0x20b   :  { %193 = vrot.lane.b32.xlu0 %v3127_v39, %s3052_s8 }
 0x27b   :  { %v272_v41 = vpop.permute.xlu1 %271 }
 0x27d   :  { %v194_v40 = vpop.permute.xlu0 %193 }
 0x27e   :  { %2757 = vmatpush3.xpose.msk.msra.mxu1 %vm195_vm2, %v194_v40 }
 0x27f   :  { %2761 = vmatprep.subr.mxu1 %v3050_v34 }
 0x281   :  { %2759 = vmatmul.mubr.msk.f32.vlgmr.msra.gmra.mxu1 %vm195_vm2, %v3127_v39 }
 0x282   :  { %2762 = vmatpush3.xpose.msk.msra.mxu1 %vm195_vm2, %v272_v41  ;;  %2763 = vmatprep.mubr.msk.f32.mxu1 %vm3051_vm1, %v3050_v34 }
 0x283   :  { %2771 = vmatprep.subr.mxu1 %v3050_v34 }
 0x285   :  { %2764 = vmatmul.mubr.msk.f32.vlgmr.msra.gmra.mxu1 %vm195_vm2, %v3125_v37 }
 0x286   :  { %2773 = vmatprep.mubr.msk.f32.mxu1 %vm3051_vm1, %v3050_v34 }
 0x341   :  { %v266_v54 = vpop.f32.mrf.mxu1 }
 0x342   :  { %v347_v55 = vmul.f32 0.25, %v266_v54 }
 0x343   :  { %v2760_v56 = vpop.f32.mrf.mxu1 }
 0x344   :  { %v382_v57 = vadd.f32 %v3148_v52, %v347_v55 }
 0x345   :  { %v343_v59 = vpop.f32.mrf.mxu1 }
 0x346   :  { %v348_v60 = vmul.f32 0.25, %v343_v59  ;;  %v385_v61 = vsel %vm384_vm3, %v382_v57, -inf }
 0x347   :  { %v2765_v62 = vpop.f32.mrf.mxu1  ;;  %386 = vmax.xlane.f32.xlu1 %v385_v61  ;;  %v86_v61 = vld [vmem:[#allocation2 + $0x68] sm:$0xff] }
 0x348   :  { %v383_v63 = vadd.f32 %v3151_v58, %v348_v60  ;;  %v85_v62 = vld [vmem:[#allocation2 + $0x48] sm:$0xff] }
 0x34a   :  { %v388_v0 = vsel %vm384_vm3, %v383_v63, -inf }
 0x34b   :  { %389 = vmax.xlane.f32.xlu0 %v388_v0 }
 0x358   :  { %483 = vrot.lane.b32.xlu1 %v3125_v37, %s3054_s1 }
 0x35c   :  { %561 = vrot.lane.b32.xlu1 %v3127_v39, %s3055_s11 }
 0x360   :  { %639 = vrot.lane.b32.xlu1 %v3125_v37, %s3055_s11 }
 0x3d0   :  { %v387_v1 = vpop.xlane.xlu1 %386 }
 0x3d1   :  { %v391_v2 = vsub.f32 %v382_v57, %v387_v1 }
 0x3d3   :  { %v393_v3 = vmul.f32 1.442695, %v391_v2 }
 0x3d4   :  { %v484_v4 = vpop.permute.xlu1 %483  ;;  %v390_v5 = vpop.xlane.xlu0 %389 }
 0x3d5   :  { %2967 = vpow2.f32 %v393_v3  ;;  %v392_v6 = vsub.f32 %v383_v63, %v390_v5  ;;  %2772 = vmatpush3.msra.mxu1 %v484_v4  ;;  %v83_v63 = vld [vmem:[#allocation2 + $0x8] sm:$0xff] }
 0x3d6   :  { %2781 = vmatprep.subr.mxu1 %v3050_v34 }
 0x3d7   :  { %v395_v7 = vmul.f32 1.442695, %v392_v6 }
 0x3d8   :  { %v562_v12 = vpop.permute.xlu1 %561 }
 0x3d9   :  { %2969 = vpow2.f32 %v395_v7 }
 0x3dc   :  { %v640_v13 = vpop.permute.xlu1 %639 }
 0x3e2   :  { %v2968_v8 = vpop.eup %2967 }
 0x3e3   :  { %v397_v9 = vsel %vm384_vm3, %v2968_v8, 0.0 }
 0x3e4   :  { %398 = vadd.xlane.f32.xlu0 %v397_v9 }
 0x3e6   :  { %v2970_v10 = vpop.eup %2969 }
 0x3e7   :  { %v400_v11 = vsel %vm384_vm3, %v2970_v10, 0.0 }
 0x3e8   :  { %401 = vadd.xlane.f32.xlu1 %v400_v11 }
 0x3f9   :  { %637 = vrot.lane.b32.xlu1 %v3125_v37, %s3056_s12 }
 0x3fa   :  { %407 = vrot.lane.b32.xlu0 %v3127_v39, %s3054_s1 }
 0x3fe   :  { %559 = vrot.lane.b32.xlu0 %v3127_v39, %s3056_s12 }
 0x46d   :  { %v399_v14 = vpop.xlane.xlu0 %398 }
 0x46e   :  { %2971 = vrcp.f32 %v399_v14 }
 0x471   :  { %v402_v15 = vpop.xlane.xlu1 %401  ;;  %v408_v16 = vpop.permute.xlu0 %407 }
 0x472   :  { %2973 = vrcp.f32 %v402_v15  ;;  %2767 = vmatpush3.msra.mxu0 %v408_v16 }
 0x473   :  { %2776 = vmatprep.subr.mxu0 %v3050_v34 }
 0x475   :  { %v560_v21 = vpop.permute.xlu0 %559  ;;  %v638_v22 = vpop.permute.xlu1 %637 }
 0x47b   :  { %v2972_v17 = vpop.eup %2971 }
 0x47c   :  { %v405_v18 = vmul.f32 %v2972_v17, %v2968_v8  ;;  %v2602_v8 = vld [vmem:[%s3438_s3 + $0x5] ss:$0 sm:$0xff] }
 0x47e   :  { %2769 = vmatmul.mubr.msk.f32.vlgmr.msra.gmra.mxu0 %vm384_vm3, %v405_v18 }
 0x47f   :  { %v2974_v19 = vpop.eup %2973  ;;  %2777 = vmatpush3.xpose.msk.msra.mxu0 %vm195_vm2, %v562_v12  ;;  %2778 = vmatprep.mubr.msk.f32.mxu0 %vm3051_vm1, %v3050_v34 }
 0x480   :  { %v406_v20 = vmul.f32 %v2974_v19, %v2970_v10  ;;  %2786 = vmatprep.subr.mxu0 %v3050_v34 }
 0x482   :  { %2774 = vmatmul.mubr.msk.f32.vlgmr.msra.gmra.mxu1 %vm384_vm3, %v406_v20  ;;  %2779 = vmatmul.mubr.msk.f32.vlgmr.msra.gmra.mxu0 %vm195_vm2, %v560_v21 }
 0x483   :  { %2782 = vmatpush3.xpose.msk.msra.mxu1 %vm195_vm2, %v640_v13  ;;  %2783 = vmatprep.mubr.msk.f32.mxu1 %vm3051_vm1, %v3050_v34 }
 0x484   :  { %2791 = vmatprep.subr.mxu1 %v3050_v34  ;;  %2788 = vmatprep.mubr.msk.f32.mxu0 %vm3051_vm1, %v3050_v34 }
 0x486   :  { %2784 = vmatmul.mubr.msk.f32.vlgmr.msra.gmra.mxu1 %vm195_vm2, %v638_v22 }
 0x487   :  { %2793 = vmatprep.mubr.msk.f32.mxu1 %vm3051_vm1, %v3050_v34 }
 0x53e   :  { %v3188_v23 = vpop.f32.mrf.mxu0 }
 0x540   :  { %v2770_v24 = vpop.f32.mrf.mxu0 }
 0x542   :  { %v3190_v25 = vpop.f32.mrf.mxu1  ;;  %v633_v26 = vpop.f32.mrf.mxu0 }
 0x543   :  { %v715_v27 = vmul.f32 0.25, %v633_v26  ;;  %v90_v26 = vld [vmem:[#allocation2 + $0x70] sm:$0xff] }
 0x544   :  { %v2775_v28 = vpop.f32.mrf.mxu1  ;;  %v2780_v29 = vpop.f32.mrf.mxu0 }
 0x545   :  { %v717_v30 = vadd.f32 %v715_v27, %v3148_v52  ;;  %v88_v27 = vld [vmem:[#allocation2 + $0x30] sm:$0xff] }
 0x546   :  { %v711_v32 = vpop.f32.mrf.mxu1  ;;  %v87_v28 = vld [vmem:[#allocation2 + $0x10] sm:$0xff] }
 0x547   :  { %v716_v35 = vmul.f32 0.25, %v711_v32  ;;  %v719_v36 = vsel %vm384_vm3, %v717_v30, -inf }
 0x548   :  { %v2785_v38 = vpop.f32.mrf.mxu1  ;;  %720 = vmax.xlane.f32.xlu0 %v719_v36 }
 0x549   :  { %v718_v40 = vadd.f32 %v716_v35, %v3151_v58 }
 0x54b   :  { %v722_v41 = vsel %vm384_vm3, %v718_v40, -inf }
 0x54c   :  { %723 = vmax.xlane.f32.xlu1 %v722_v41  ;;  %v2605_v41 = vld [vmem:[%s3438_s3 + $0x6] ss:$0 sm:$0xff] }
 0x55d   :  { %817 = vrot.lane.b32.xlu1 %v3125_v37, %s3057_s13 }
 0x5d1   :  { %v721_v42 = vpop.xlane.xlu0 %720 }
 0x5d2   :  { %v725_v43 = vsub.f32 %v717_v30, %v721_v42 }
 0x5d4   :  { %v727_v44 = vmul.f32 1.442695, %v725_v43  ;;  %v2606_v43 = vld [vmem:[%s3438_s3 + $0x7] ss:$0 sm:$0xff] }
 0x5d5   :  { %v724_v45 = vpop.xlane.xlu1 %723 }
 0x5d6   :  { %2975 = vpow2.f32 %v727_v44  ;;  %v726_v46 = vsub.f32 %v718_v40, %v724_v45 }
 0x5d8   :  { %v729_v47 = vmul.f32 1.442695, %v726_v46 }
 0x5d9   :  { %v818_v48 = vpop.permute.xlu1 %817 }
 0x5da   :  { %2977 = vpow2.f32 %v729_v47  ;;  %2792 = vmatpush3.msra.mxu1 %v818_v48 }
 0x5db   :  { %2807 = vmatprep.subr.mxu1 %v90_v26 }
 0x5e3   :  { %v2976_v49 = vpop.eup %2975 }
 0x5e4   :  { %v731_v50 = vsel %vm384_vm3, %v2976_v49, 0.0 }
 0x5e5   :  { %732 = vadd.xlane.f32.xlu0 %v731_v50  ;;  %v98_v50 = vld [vmem:[#allocation2 + $0xf8] sm:$0xff] }
 0x5e7   :  { %v2978_v51 = vpop.eup %2977 }
 0x5e8   :  { %v734_v53 = vsel %vm384_vm3, %v2978_v51, 0.0 }
 0x5e9   :  { %735 = vadd.xlane.f32.xlu0 %v734_v53  ;;  %v96_v53 = vld [vmem:[#allocation2 + $0xb8] sm:$0xff] }
 0x5ff   :  { %741 = vrot.lane.b32.xlu0 %v3127_v39, %s3057_s13  ;;  %v84_v39 = vld [vmem:[#allocation2 + $0x28] sm:$0xff] }
 0x66e   :  { %v733_v37 = vpop.xlane.xlu0 %732 }
 0x66f   :  { %2979 = vrcp.f32 %v733_v37  ;;  %v95_v37 = vld [vmem:[#allocation2 + $0x98] sm:$0xff] }
 0x672   :  { %v736_v54 = vpop.xlane.xlu0 %735 }
 0x673   :  { %2981 = vrcp.f32 %v736_v54  ;;  %v94_v54 = vld [vmem:[#allocation2 + $0x78] sm:$0xff] }
 0x676   :  { %v742_v55 = vpop.permute.xlu0 %741 }
 0x677   :  { %2787 = vmatpush3.msra.mxu0 %v742_v55  ;;  %v93_v55 = vld [vmem:[#allocation2 + $0x58] sm:$0xff] }
 0x678   :  { %2796 = vmatprep.subr.mxu0 %v86_v61 }
 0x67c   :  { %v2980_v56 = vpop.eup %2979 }
 0x67d   :  { %v739_v57 = vmul.f32 %v2980_v56, %v2976_v49  ;;  %v92_v56 = vld [vmem:[#allocation2 + $0x38] sm:$0xff] }
 0x67f   :  { %2789 = vmatmul.mubr.msk.f32.vlgmr.msra.gmra.mxu0 %vm384_vm3, %v739_v57  ;;  %v91_v57 = vld [vmem:[#allocation2 + $0x18] sm:$0xff] }
 0x680   :  { %v2982_v59 = vpop.eup %2981  ;;  %2797 = vmatpush3.msra.mxu0 %v86_v61 }
 0x681   :  { %v740_v60 = vmul.f32 %v2982_v59, %v2978_v51  ;;  %2798 = vmatprep.subr.mxu0 %v85_v62  ;;  %v97_v51 = vld [vmem:[#allocation2 + $0xd8] sm:$0xff]  ;;  %v2607_v59 = vld [vmem:[%s3438_s3 + $0x8] ss:$0 sm:$0xff] }
 0x682   :  { %2799 = vmatpush3.msra.mxu0 %v85_v62 }
 0x683   :  { %2794 = vmatmul.mubr.msk.f32.vlgmr.msra.gmra.mxu1 %vm384_vm3, %v740_v60  ;;  %2800 = vmatprep.subr.mxu0 %v84_v39 }
 0x684   :  { %2801 = vmatpush3.msra.mxu0 %v84_v39  ;;  %2808 = vmatpush3.msra.mxu1 %v90_v26 }
 0x685   :  { %2802 = vmatprep.subr.mxu0 %v83_v63 }
 0x686   :  { %2803 = vmatpush3.msra.mxu0 %v83_v63 }
 0x687   :  { %2818 = vmatprep.subr.mxu0 %v98_v50 }
 0x73f   :  { %v813_v0 = vpop.f32.mrf.mxu0 }
 0x740   :  { %895 = vrot.lane.b32.xlu1 %v813_v0, %s3058_s14 }
 0x741   :  { %v2790_v1 = vpop.f32.mrf.mxu0 }
 0x743   :  { %v889_v2 = vpop.f32.mrf.mxu1 }
 0x744   :  { %897 = vrot.lane.b32.xlu1 %v889_v2, %s3058_s14 }
 0x745   :  { %v2795_v3 = vpop.f32.mrf.mxu1 }
 0x7b2   :  { %v896_v4 = vpop.permute.xlu1 %895 }
 0x7b3   :  { %v901_v5 = vsel %vm195_vm2, %v3188_v23, %v896_v4 }
 0x7b4   :  { %2804 = vmatprep.mubr.msk.f32.mxu0 %vm39_vm0, %v901_v5 }
 0x7b6   :  { %v898_v6 = vpop.permute.xlu1 %897 }
 0x7b7   :  { %v902_v7 = vsel %vm195_vm2, %v3190_v25, %v898_v6 }
 0x7b8   :  { %2805 = vmatmul.mubr.msk.f32.vlgmr.msra.gmra.mxu0 %vm39_vm0, %v902_v7 }
 0x7b9   :  { %2819 = vmatpush3.msra.mxu0 %v98_v50  ;;  %v2613_v50 = vld [vmem:[%s3438_s3 + $0xa] ss:$0 sm:$0xff] }
 0x7ba   :  { %2820 = vmatprep.subr.mxu0 %v97_v51 }
 0x7bb   :  { %2821 = vmatpush3.msra.mxu0 %v97_v51 }
 0x7bc   :  { %2822 = vmatprep.subr.mxu0 %v96_v53 }
 0x7bd   :  { %2823 = vmatpush3.msra.mxu0 %v96_v53 }
 0x7be   :  { %2824 = vmatprep.subr.mxu0 %v95_v37 }
 0x7bf   :  { %2825 = vmatpush3.msra.mxu0 %v95_v37 }
 0x7c0   :  { %2826 = vmatprep.subr.mxu0 %v94_v54 }
 0x7c1   :  { %2827 = vmatpush3.msra.mxu0 %v94_v54 }
 0x7c2   :  { %2828 = vmatprep.subr.mxu0 %v93_v55 }
 0x7c3   :  { %2829 = vmatpush3.msra.mxu0 %v93_v55  ;;  %v2614_v55 = vld [vmem:[%s3438_s3 + $0xb] ss:$0 sm:$0xff] }
 0x7c4   :  { %2830 = vmatprep.subr.mxu0 %v92_v56 }
 0x7c5   :  { %2831 = vmatpush3.msra.mxu0 %v92_v56 }
 0x7c6   :  { %2832 = vmatprep.subr.mxu0 %v91_v57 }
 0x7c7   :  { %2833 = vmatpush3.msra.mxu0 %v91_v57 }
 0x7c8   :  { %2858 = vmatprep.subr.mxu0 %v3050_v34 }
 0x878   :  { %v2806_v9 = vpop.f32.mrf.mxu0 }
 0x879   :  { %v985_v10 = vadd.f32 %v2806_v9, %v2602_v8 }
 0x87a   :  { %v979_v11 = vpop.f32.mrf.mxu0 }
 0x87b   :  { %v980_v12 = vadd.f32 %v2602_v8, %v979_v11  ;;  %v989_v13 = vadd.f32 %v985_v10, %v3112_v33 }
 0x87d   :  { %v993_v14 = vsel %vm39_vm0, %v989_v13, 0.0  ;;  %v988_v15 = vadd.f32 %v980_v12, %v3108_v31  ;;  %v89_v31 = vld [vmem:[#allocation2 + $0x50] sm:$0xff] }
 0x87e   :  { %994 = vadd.xlane.f32.xlu1 %v993_v14  ;;  %2809 = vmatprep.subr.mxu1 %v89_v31 }
 0x87f   :  { %v990_v16 = vsel %vm39_vm0, %v988_v15, 0.0  ;;  %2810 = vmatpush3.msra.mxu1 %v89_v31 }
 0x880   :  { %991 = vadd.xlane.f32.xlu0 %v990_v16  ;;  %2811 = vmatprep.subr.mxu1 %v88_v27 }
 0x881   :  { %2812 = vmatpush3.msra.mxu1 %v88_v27 }
 0x882   :  { %2813 = vmatprep.subr.mxu1 %v87_v28 }
 0x883   :  { %2814 = vmatpush3.msra.mxu1 %v87_v28 }
 0x907   :  { %v995_v17 = vpop.xlane.xlu1 %994 }
 0x908   :  { %v997_v18 = vmul.f32 0.03125, %v995_v17  ;;  %v2610_v17 = vld [vmem:[%s3438_s3 + $0x9] ss:$0 sm:$0xff] }
 0x909   :  { %v992_v19 = vpop.xlane.xlu0 %991 }
 0x90a   :  { %v996_v20 = vmul.f32 0.03125, %v992_v19  ;;  %v999_v21 = vsub.f32 %v989_v13, %v997_v18 }
 0x90c   :  { %v998_v22 = vsub.f32 %v988_v15, %v996_v20  ;;  %v1001_v25 = vmul.f32 %v999_v21, %v999_v21 }
 0x90e   :  { %v1000_v23 = vmul.f32 %v998_v22, %v998_v22  ;;  %v1005_v33 = vsel %vm39_vm0, %v1001_v25, 0.0 }
 0x910   :  { %v1002_v24 = vsel %vm39_vm0, %v1000_v23, 0.0 }
 0x911   :  { %1003 = vadd.xlane.f32.xlu0 %v1002_v24 }
 0x915   :  { %1006 = vadd.xlane.f32.xlu0 %v1005_v33 }
 0x99a   :  { %v1004_v29 = vpop.xlane.xlu0 %1003 }
 0x99b   :  { %v1008_v30 = vmul.f32 0.03125, %v1004_v29 }
 0x99d   :  { %v1010_v32 = vadd.f32 1e-12, %v1008_v30 }
 0x99e   :  { %v1007_v35 = vpop.xlane.xlu0 %1006 }
 0x99f   :  { %2983 = vrsqrt.f32 %v1010_v32  ;;  %v1009_v36 = vmul.f32 0.03125, %v1007_v35 }
 0x9a1   :  { %v1011_v38 = vadd.f32 1e-12, %v1009_v36 }
 0x9a3   :  { %2985 = vrsqrt.f32 %v1011_v38  ;;  %v1261_v38 = vld [vmem:[#allocation2 + $0x160] sm:$0xff] }
 0x9a4   :  { %2837 = vmatprep.subr.mxu1 %v1261_v38 }
 0x9ac   :  { %v2984_v40 = vpop.eup %2983 }
 0x9ad   :  { %v1014_v42 = vmul.f32 %v2984_v40, %v998_v22  ;;  %v1260_v40 = vld [vmem:[#allocation2 + $0x140] sm:$0xff] }
 0x9af   :  { %v1020_v44 = vmul.f32 %v2605_v41, %v1014_v42  ;;  %v1258_v42 = vld [vmem:[#allocation2 + $0x100] sm:$0xff] }
 0x9b0   :  { %v2986_v45 = vpop.eup %2985 }
 0x9b1   :  { %v1015_v46 = vmul.f32 %v2986_v45, %v999_v21  ;;  %v3227_v47 = vadd.f32 %v2606_v43, %v1020_v44 }
 0x9b3   :  { %v1021_v48 = vmul.f32 %v2605_v41, %v1015_v46  ;;  %2815 = vmatprep.mubr.msk.f32.mxu1 %vm39_vm0, %v3227_v47  ;;  %v1259_v41 = vld [vmem:[#allocation2 + $0x120] sm:$0xff] }
 0x9b5   :  { %v1027_v49 = vadd.f32 %v2606_v43, %v1021_v48 }
 0x9b7   :  { %2816 = vmatmul.mubr.msk.f32.vlgmr.msra.gmra.mxu1 %vm39_vm0, %v1027_v49 }
 0x9b8   :  { %2838 = vmatpush3.msra.mxu1 %v1261_v38 }
 0x9b9   :  { %2839 = vmatprep.subr.mxu1 %v1260_v40 }
 0x9ba   :  { %2840 = vmatpush3.msra.mxu1 %v1260_v40 }
 0x9bb   :  { %2841 = vmatprep.subr.mxu1 %v1259_v41 }
 0x9bc   :  { %2842 = vmatpush3.msra.mxu1 %v1259_v41 }
 0x9bd   :  { %2843 = vmatprep.subr.mxu1 %v1258_v42 }
 0x9be   :  { %2844 = vmatpush3.msra.mxu1 %v1258_v42 }
 0x9bf   :  { %2848 = vmatprep.subr.mxu1 %v3050_v34 }
 0xa77   :  { %v2817_v60 = vpop.f32.mrf.mxu1 }
 0xa78   :  { %v1110_v61 = vadd.f32 %v2817_v60, %v2607_v59  ;;  %v2615_v60 = vld [vmem:[%s3438_s3 + $0xc] ss:$0 sm:$0xff] }
 0xa79   :  { %v1104_v62 = vpop.f32.mrf.mxu1 }
 0xa7a   :  { %v1116_v39 = vmul.f32 0.044715, %v1110_v61  ;;  %v1105_v63 = vadd.f32 %v2607_v59, %v1104_v62  ;;  %v1114_v14 = vmul.f32 0.5, %v1110_v61 }
 0xa7c   :  { %v1118_v0 = vmul.f32 %v1116_v39, %v1110_v61  ;;  %v1115_v1 = vmul.f32 0.044715, %v1105_v63  ;;  %v1113_v12 = vmul.f32 0.5, %v1105_v63 }
 0xa7e   :  { %v1120_v2 = vmul.f32 %v1118_v0, %v1110_v61  ;;  %v1117_v3 = vmul.f32 %v1115_v1, %v1105_v63 }
 0xa80   :  { %v1122_v4 = vadd.f32 %v1120_v2, %v1110_v61  ;;  %v1119_v5 = vmul.f32 %v1117_v3, %v1105_v63 }
 0xa82   :  { %v1124_v6 = vmul.f32 0.7978846, %v1122_v4  ;;  %v1121_v7 = vadd.f32 %v1119_v5, %v1105_v63 }
 0xa84   :  { %2987 = vtanh.f32 %v1124_v6  ;;  %v1123_v8 = vmul.f32 0.7978846, %v1121_v7 }
 0xa86   :  { %2989 = vtanh.f32 %v1123_v8 }
 0xa91   :  { %v2988_v9 = vpop.eup %2987 }
 0xa92   :  { %v1128_v11 = vadd.f32 1.0, %v2988_v9 }
 0xa93   :  { %v2990_v10 = vpop.eup %2989 }
 0xa94   :  { %v1127_v13 = vadd.f32 1.0, %v2990_v10  ;;  %v1130_v16 = vmul.f32 %v1128_v11, %v1114_v14 }
 0xa96   :  { %v1129_v15 = vmul.f32 %v1127_v13, %v1113_v12 }
 0xa98   :  { %2834 = vmatprep.mubr.msk.f32.mxu0 %vm1135_vm4, %v1129_v15 }
 0xa99   :  { %2835 = vmatmul.mubr.msk.f32.vlgmr.msra.gmra.mxu0 %vm1135_vm4, %v1130_v16 }
 0xa9a   :  { %2860 = vmatprep.mubr.msk.f32.mxu0 %vm3051_vm1, %v3050_v34 }
 0xb59   :  { %v2836_v18 = vpop.f32.mrf.mxu0 }
 0xb5a   :  { %v1214_v19 = vadd.f32 %v2836_v18, %v2610_v17 }
 0xb5b   :  { %v1208_v20 = vpop.f32.mrf.mxu0 }
 0xb5c   :  { %v1209_v21 = vadd.f32 %v2610_v17, %v1208_v20  ;;  %v1218_v22 = vadd.f32 %v1214_v19, %v1027_v49 }
 0xb5e   :  { %v1222_v23 = vsel %vm39_vm0, %v1218_v22, 0.0  ;;  %v1217_v24 = vadd.f32 %v1209_v21, %v3227_v47 }
 0xb5f   :  { %1223 = vadd.xlane.f32.xlu1 %v1222_v23 }
 0xb60   :  { %v1219_v25 = vsel %vm39_vm0, %v1217_v24, 0.0 }
 0xb61   :  { %1220 = vadd.xlane.f32.xlu0 %v1219_v25 }
 0xbe8   :  { %v1224_v33 = vpop.xlane.xlu1 %1223 }
 0xbe9   :  { %v1226_v26 = vmul.f32 0.03125, %v1224_v33 }
 0xbea   :  { %v1221_v31 = vpop.xlane.xlu0 %1220 }
 0xbeb   :  { %v1228_v27 = vsub.f32 %v1218_v22, %v1226_v26  ;;  %v1225_v28 = vmul.f32 0.03125, %v1221_v31 }
 0xbed   :  { %v1227_v29 = vsub.f32 %v1217_v24, %v1225_v28  ;;  %v1230_v30 = vmul.f32 %v1228_v27, %v1228_v27 }
 0xbef   :  { %v1234_v32 = vsel %vm39_vm0, %v1230_v30, 0.0  ;;  %v1229_v35 = vmul.f32 %v1227_v29, %v1227_v29 }
 0xbf0   :  { %1235 = vadd.xlane.f32.xlu1 %v1234_v32 }
 0xbf1   :  { %v1231_v36 = vsel %vm39_vm0, %v1229_v35, 0.0 }
 0xbf2   :  { %1232 = vadd.xlane.f32.xlu0 %v1231_v36 }
 0xc79   :  { %v1236_v43 = vpop.xlane.xlu1 %1235 }
 0xc7a   :  { %v1238_v44 = vmul.f32 0.03125, %v1236_v43 }
 0xc7b   :  { %v1233_v45 = vpop.xlane.xlu0 %1232 }
 0xc7c   :  { %v1240_v46 = vadd.f32 1e-12, %v1238_v44  ;;  %v1237_v47 = vmul.f32 0.03125, %v1233_v45 }
 0xc7e   :  { %2991 = vrsqrt.f32 %v1240_v46  ;;  %v1239_v48 = vadd.f32 1e-12, %v1237_v47 }
 0xc80   :  { %2993 = vrsqrt.f32 %v1239_v48 }
 0xc8b   :  { %v2992_v49 = vpop.eup %2991 }
 0xc8c   :  { %v1244_v51 = vmul.f32 %v2992_v49, %v1228_v27 }
 0xc8d   :  { %v2994_v53 = vpop.eup %2993 }
 0xc8e   :  { %v1243_v37 = vmul.f32 %v2994_v53, %v1227_v29  ;;  %v1250_v54 = vmul.f32 %v2613_v50, %v1244_v51 }
 0xc90   :  { %v1249_v56 = vmul.f32 %v2613_v50, %v1243_v37  ;;  %v3257_v59 = vadd.f32 %v2614_v55, %v1250_v54 }
 0xc92   :  { %v3255_v57 = vadd.f32 %v2614_v55, %v1249_v56 }
 0xc94   :  { %2845 = vmatprep.mubr.msk.f32.mxu1 %vm39_vm0, %v3255_v57 }
 0xc95   :  { %2846 = vmatmul.mubr.msk.f32.vlgmr.msra.gmra.mxu1 %vm39_vm0, %v3257_v59 }
 0xc96   :  { %2850 = vmatprep.mubr.msk.f32.mxu1 %vm3051_vm1, %v3050_v34 }
 0xd55   :  { %v2847_v61 = vpop.f32.mrf.mxu1 }
 0xd56   :  { %v3268_v62 = vadd.f32 %v2847_v61, %v2615_v60 }
 0xd57   :  { %v1362_v39 = vpop.f32.mrf.mxu1 }
 0xd58   :  { %v3270_v63 = vadd.f32 %v2615_v60, %v1362_v39  ;;  %1449 = vrot.lane.b32.xlu1 %v3268_v62, %s3052_s8 }
 0xd5a   :  { %1372 = vrot.lane.b32.xlu0 %v3270_v63, %s3052_s8 }
 0xdca   :  { %v1450_v1 = vpop.permute.xlu1 %1449 }
 0xdcc   :  { %v1373_v0 = vpop.permute.xlu0 %1372 }
 0xdcd   :  { %2849 = vmatpush3.xpose.msk.msra.mxu1 %vm195_vm2, %v1373_v0 }
 0xdce   :  { %2853 = vmatprep.subr.mxu1 %v3050_v34 }
 0xdd0   :  { %2851 = vmatmul.mubr.msk.f32.vlgmr.msra.gmra.mxu1 %vm195_vm2, %v3270_v63 }
 0xdd1   :  { %2854 = vmatpush3.xpose.msk.msra.mxu1 %vm195_vm2, %v1450_v1  ;;  %2855 = vmatprep.mubr.msk.f32.mxu1 %vm3051_vm1, %v3050_v34 }
 0xdd2   :  { %2863 = vmatprep.subr.mxu1 %v3050_v34 }
 0xdd4   :  { %2856 = vmatmul.mubr.msk.f32.vlgmr.msra.gmra.mxu1 %vm195_vm2, %v3268_v62 }
 0xdd5   :  { %2865 = vmatprep.mubr.msk.f32.mxu1 %vm3051_vm1, %v3050_v34 }
 0xe90   :  { %v1444_v2 = vpop.f32.mrf.mxu1 }
 0xe91   :  { %v1525_v3 = vmul.f32 0.25, %v1444_v2 }
 0xe92   :  { %v2852_v4 = vpop.f32.mrf.mxu1 }
 0xe93   :  { %v1527_v5 = vadd.f32 %v1525_v3, %v3148_v52 }
 0xe94   :  { %v1521_v6 = vpop.f32.mrf.mxu1 }
 0xe95   :  { %v1526_v7 = vmul.f32 0.25, %v1521_v6  ;;  %v1529_v8 = vsel %vm384_vm3, %v1527_v5, -inf  ;;  %v1265_v6 = vld [vmem:[#allocation2 + $0x168] sm:$0xff] }
 0xe96   :  { %1530 = vmax.xlane.f32.xlu1 %v1529_v8  ;;  %v2857_v9 = vpop.f32.mrf.mxu1  ;;  %v1262_v8 = vld [vmem:[#allocation2 + $0x108] sm:$0xff] }
 0xe97   :  { %v1528_v10 = vadd.f32 %v1526_v7, %v3151_v58  ;;  %v1264_v7 = vld [vmem:[#allocation2 + $0x148] sm:$0xff] }
 0xe99   :  { %v1532_v11 = vsel %vm384_vm3, %v1528_v10, -inf }
 0xe9a   :  { %1533 = vmax.xlane.f32.xlu0 %v1532_v11 }
 0xea7   :  { %1627 = vrot.lane.b32.xlu1 %v3268_v62, %s3054_s1 }
 0xeab   :  { %1705 = vrot.lane.b32.xlu1 %v3270_v63, %s3055_s11 }
 0xeaf   :  { %1783 = vrot.lane.b32.xlu1 %v3268_v62, %s3055_s11 }
 0xf1f   :  { %v1531_v12 = vpop.xlane.xlu1 %1530 }
 0xf20   :  { %v1535_v13 = vsub.f32 %v1527_v5, %v1531_v12 }
 0xf22   :  { %v1537_v14 = vmul.f32 1.442695, %v1535_v13 }
 0xf23   :  { %v1628_v15 = vpop.permute.xlu1 %1627  ;;  %v1534_v16 = vpop.xlane.xlu0 %1533 }
 0xf24   :  { %2995 = vpow2.f32 %v1537_v14  ;;  %v1536_v17 = vsub.f32 %v1528_v10, %v1534_v16  ;;  %2864 = vmatpush3.msra.mxu1 %v1628_v15 }
 0xf25   :  { %2873 = vmatprep.subr.mxu1 %v3050_v34 }
 0xf26   :  { %v1539_v18 = vmul.f32 1.442695, %v1536_v17  ;;  %v2630_v17 = vld [vmem:[%s3438_s3 + $0xd] ss:$0 sm:$0xff] }
 0xf27   :  { %v1706_v23 = vpop.permute.xlu1 %1705 }
 0xf28   :  { %2997 = vpow2.f32 %v1539_v18 }
 0xf2b   :  { %v1784_v24 = vpop.permute.xlu1 %1783 }
 0xf31   :  { %v2996_v19 = vpop.eup %2995 }
 0xf32   :  { %v1541_v20 = vsel %vm384_vm3, %v2996_v19, 0.0 }
 0xf33   :  { %1542 = vadd.xlane.f32.xlu0 %v1541_v20 }
 0xf35   :  { %v2998_v21 = vpop.eup %2997 }
 0xf36   :  { %v1544_v22 = vsel %vm384_vm3, %v2998_v21, 0.0 }
 0xf37   :  { %1545 = vadd.xlane.f32.xlu1 %v1544_v22 }
 0xf48   :  { %1781 = vrot.lane.b32.xlu1 %v3268_v62, %s3056_s12 }
 0xf49   :  { %1551 = vrot.lane.b32.xlu0 %v3270_v63, %s3054_s1 }
 0xf4d   :  { %1703 = vrot.lane.b32.xlu0 %v3270_v63, %s3056_s12 }
 0xfbc   :  { %v1543_v25 = vpop.xlane.xlu0 %1542 }
 0xfbd   :  { %2999 = vrcp.f32 %v1543_v25 }
 0xfc0   :  { %v1546_v33 = vpop.xlane.xlu1 %1545  ;;  %v1552_v26 = vpop.permute.xlu0 %1551 }
 0xfc1   :  { %3001 = vrcp.f32 %v1546_v33  ;;  %2859 = vmatpush3.msra.mxu0 %v1552_v26 }
 0xfc2   :  { %2868 = vmatprep.subr.mxu0 %v3050_v34 }
 0xfc4   :  { %v1704_v30 = vpop.permute.xlu0 %1703  ;;  %v1782_v32 = vpop.permute.xlu1 %1781 }
 0xfca   :  { %v3000_v31 = vpop.eup %2999 }
 0xfcb   :  { %v1549_v27 = vmul.f32 %v3000_v31, %v2996_v19 }
 0xfcd   :  { %2861 = vmatmul.mubr.msk.f32.vlgmr.msra.gmra.mxu0 %vm384_vm3, %v1549_v27 }
 0xfce   :  { %v3002_v28 = vpop.eup %3001  ;;  %2869 = vmatpush3.xpose.msk.msra.mxu0 %vm195_vm2, %v1706_v23  ;;  %2870 = vmatprep.mubr.msk.f32.mxu0 %vm3051_vm1, %v3050_v34 }
 0xfcf   :  { %v1550_v29 = vmul.f32 %v3002_v28, %v2998_v21  ;;  %2878 = vmatprep.subr.mxu0 %v3050_v34 }
 0xfd1   :  { %2866 = vmatmul.mubr.msk.f32.vlgmr.msra.gmra.mxu1 %vm384_vm3, %v1550_v29  ;;  %2871 = vmatmul.mubr.msk.f32.vlgmr.msra.gmra.mxu0 %vm195_vm2, %v1704_v30 }
 0xfd2   :  { %2874 = vmatpush3.xpose.msk.msra.mxu1 %vm195_vm2, %v1784_v24  ;;  %2875 = vmatprep.mubr.msk.f32.mxu1 %vm3051_vm1, %v3050_v34 }
 0xfd3   :  { %2883 = vmatprep.subr.mxu1 %v3050_v34  ;;  %2880 = vmatprep.mubr.msk.f32.mxu0 %vm3051_vm1, %v3050_v34 }
 0xfd5   :  { %2876 = vmatmul.mubr.msk.f32.vlgmr.msra.gmra.mxu1 %vm195_vm2, %v1782_v32 }
 0xfd6   :  { %2885 = vmatprep.mubr.msk.f32.mxu1 %vm3051_vm1, %v3050_v34 }
0x108d   :  { %v3324_v35 = vpop.f32.mrf.mxu0 }
0x108f   :  { %v2862_v36 = vpop.f32.mrf.mxu0 }
0x1090   :  { %v1269_v36 = vld [vmem:[#allocation2 + $0x170] sm:$0xff] }
0x1091   :  { %v3326_v38 = vpop.f32.mrf.mxu1  ;;  %v1777_v40 = vpop.f32.mrf.mxu0 }
0x1092   :  { %v1859_v41 = vmul.f32 0.25, %v1777_v40  ;;  %v1266_v40 = vld [vmem:[#allocation2 + $0x110] sm:$0xff] }
0x1093   :  { %v2867_v42 = vpop.f32.mrf.mxu1  ;;  %v2872_v43 = vpop.f32.mrf.mxu0 }
0x1094   :  { %v1861_v44 = vadd.f32 %v1859_v41, %v3148_v52 }
0x1095   :  { %v1855_v45 = vpop.f32.mrf.mxu1 }
0x1096   :  { %v1860_v46 = vmul.f32 0.25, %v1855_v45  ;;  %v1863_v47 = vsel %vm384_vm3, %v1861_v44, -inf }
0x1097   :  { %1864 = vmax.xlane.f32.xlu0 %v1863_v47  ;;  %v2877_v48 = vpop.f32.mrf.mxu1 }
0x1098   :  { %v1862_v49 = vadd.f32 %v1860_v46, %v3151_v58  ;;  %v2633_v48 = vld [vmem:[%s3438_s3 + $0xe] ss:$0 sm:$0xff] }
0x109a   :  { %v1866_v50 = vsel %vm384_vm3, %v1862_v49, -inf }
0x109b   :  { %1867 = vmax.xlane.f32.xlu1 %v1866_v50  ;;  %v2634_v50 = vld [vmem:[%s3438_s3 + $0xf] ss:$0 sm:$0xff] }
0x10ac   :  { %1961 = vrot.lane.b32.xlu1 %v3268_v62, %s3057_s13 }
0x1120   :  { %v1865_v51 = vpop.xlane.xlu0 %1864 }
0x1121   :  { %v1869_v53 = vsub.f32 %v1861_v44, %v1865_v51 }
0x1123   :  { %v1871_v37 = vmul.f32 1.442695, %v1869_v53 }
0x1124   :  { %v1868_v54 = vpop.xlane.xlu1 %1867 }
0x1125   :  { %3003 = vpow2.f32 %v1871_v37  ;;  %v1870_v52 = vsub.f32 %v1862_v49, %v1868_v54 }
0x1127   :  { %v1873_v55 = vmul.f32 1.442695, %v1870_v52 }
0x1128   :  { %v1962_v56 = vpop.permute.xlu1 %1961 }
0x1129   :  { %3005 = vpow2.f32 %v1873_v55  ;;  %2884 = vmatpush3.msra.mxu1 %v1962_v56  ;;  %v1277_v56 = vld [vmem:[#allocation2 + $0x1f8] sm:$0xff] }
0x112a   :  { %2899 = vmatprep.subr.mxu1 %v1269_v36 }
0x1132   :  { %v3004_v60 = vpop.eup %3003 }
0x1133   :  { %v1875_v61 = vsel %vm384_vm3, %v3004_v60, 0.0 }
0x1134   :  { %1876 = vadd.xlane.f32.xlu0 %v1875_v61  ;;  %v1275_v61 = vld [vmem:[#allocation2 + $0x1b8] sm:$0xff] }
0x1136   :  { %v3006_v58 = vpop.eup %3005 }
0x1137   :  { %v1878_v39 = vsel %vm384_vm3, %v3006_v58, 0.0 }
0x1138   :  { %1879 = vadd.xlane.f32.xlu0 %v1878_v39  ;;  %v1273_v39 = vld [vmem:[#allocation2 + $0x178] sm:$0xff] }
0x114e   :  { %1885 = vrot.lane.b32.xlu0 %v3270_v63, %s3057_s13  ;;  %v1263_v63 = vld [vmem:[#allocation2 + $0x128] sm:$0xff] }
0x11bd   :  { %v1877_v62 = vpop.xlane.xlu0 %1876 }
0x11be   :  { %3007 = vrcp.f32 %v1877_v62  ;;  %v1272_v62 = vld [vmem:[#allocation2 + $0x158] sm:$0xff] }
0x11c1   :  { %v1880_v0 = vpop.xlane.xlu0 %1879 }
0x11c2   :  { %3009 = vrcp.f32 %v1880_v0  ;;  %v1271_v0 = vld [vmem:[#allocation2 + $0x138] sm:$0xff] }
0x11c5   :  { %v1886_v1 = vpop.permute.xlu0 %1885 }
0x11c6   :  { %2879 = vmatpush3.msra.mxu0 %v1886_v1  ;;  %v1270_v1 = vld [vmem:[#allocation2 + $0x118] sm:$0xff] }
0x11c7   :  { %2888 = vmatprep.subr.mxu0 %v1265_v6 }
0x11cb   :  { %v3008_v2 = vpop.eup %3007 }
0x11cc   :  { %v1883_v3 = vmul.f32 %v3008_v2, %v3004_v60  ;;  %v1276_v60 = vld [vmem:[#allocation2 + $0x1d8] sm:$0xff]  ;;  %v2635_v2 = vld [vmem:[%s3438_s3 + $0x10] ss:$0 sm:$0xff] }
0x11ce   :  { %2881 = vmatmul.mubr.msk.f32.vlgmr.msra.gmra.mxu0 %vm384_vm3, %v1883_v3 }
0x11cf   :  { %v3010_v4 = vpop.eup %3009  ;;  %2889 = vmatpush3.msra.mxu0 %v1265_v6 }
0x11d0   :  { %v1884_v5 = vmul.f32 %v3010_v4, %v3006_v58  ;;  %2890 = vmatprep.subr.mxu0 %v1264_v7  ;;  %v1274_v58 = vld [vmem:[#allocation2 + $0x198] sm:$0xff] }
0x11d1   :  { %2891 = vmatpush3.msra.mxu0 %v1264_v7 }
0x11d2   :  { %2886 = vmatmul.mubr.msk.f32.vlgmr.msra.gmra.mxu1 %vm384_vm3, %v1884_v5  ;;  %2892 = vmatprep.subr.mxu0 %v1263_v63 }
0x11d3   :  { %2893 = vmatpush3.msra.mxu0 %v1263_v63  ;;  %2900 = vmatpush3.msra.mxu1 %v1269_v36 }
0x11d4   :  { %2894 = vmatprep.subr.mxu0 %v1262_v8 }
0x11d5   :  { %2895 = vmatpush3.msra.mxu0 %v1262_v8 }
0x11d6   :  { %2910 = vmatprep.subr.mxu0 %v1277_v56 }
0x128e   :  { %v1957_v9 = vpop.f32.mrf.mxu0 }
0x128f   :  { %2039 = vrot.lane.b32.xlu1 %v1957_v9, %s3058_s14 }
0x1290   :  { %v2882_v10 = vpop.f32.mrf.mxu0 }
0x1292   :  { %v2033_v11 = vpop.f32.mrf.mxu1 }
0x1293   :  { %2041 = vrot.lane.b32.xlu1 %v2033_v11, %s3058_s14 }
0x1294   :  { %v2887_v12 = vpop.f32.mrf.mxu1 }
0x1301   :  { %v2040_v13 = vpop.permute.xlu1 %2039 }
0x1302   :  { %v2045_v14 = vsel %vm195_vm2, %v3324_v35, %v2040_v13 }
0x1303   :  { %2896 = vmatprep.mubr.msk.f32.mxu0 %vm39_vm0, %v2045_v14 }
0x1305   :  { %v2042_v15 = vpop.permute.xlu1 %2041 }
0x1306   :  { %v2046_v16 = vsel %vm195_vm2, %v3326_v38, %v2042_v15  ;;  %v1267_v38 = vld [vmem:[#allocation2 + $0x130] sm:$0xff] }
0x1307   :  { %2897 = vmatmul.mubr.msk.f32.vlgmr.msra.gmra.mxu0 %vm39_vm0, %v2046_v16 }
0x1308   :  { %2911 = vmatpush3.msra.mxu0 %v1277_v56 }
0x1309   :  { %2912 = vmatprep.subr.mxu0 %v1276_v60 }
0x130a   :  { %2913 = vmatpush3.msra.mxu0 %v1276_v60  ;;  %v2642_v60 = vld [vmem:[%s3438_s3 + $0x13] ss:$0 sm:$0xff] }
0x130b   :  { %2914 = vmatprep.subr.mxu0 %v1275_v61 }
0x130c   :  { %2915 = vmatpush3.msra.mxu0 %v1275_v61 }
0x130d   :  { %2916 = vmatprep.subr.mxu0 %v1274_v58 }
0x130e   :  { %2917 = vmatpush3.msra.mxu0 %v1274_v58 }
0x130f   :  { %2918 = vmatprep.subr.mxu0 %v1273_v39 }
0x1310   :  { %2919 = vmatpush3.msra.mxu0 %v1273_v39 }
0x1311   :  { %2920 = vmatprep.subr.mxu0 %v1272_v62 }
0x1312   :  { %2921 = vmatpush3.msra.mxu0 %v1272_v62 }
0x1313   :  { %2922 = vmatprep.subr.mxu0 %v1271_v0 }
0x1314   :  { %2923 = vmatpush3.msra.mxu0 %v1271_v0 }
0x1315   :  { %2924 = vmatprep.subr.mxu0 %v1270_v1 }
0x1316   :  { %2925 = vmatpush3.msra.mxu0 %v1270_v1 }
0x13c7   :  { %v2898_v18 = vpop.f32.mrf.mxu0 }
0x13c8   :  { %v2129_v19 = vadd.f32 %v2898_v18, %v2630_v17 }
0x13c9   :  { %v2123_v20 = vpop.f32.mrf.mxu0 }
0x13ca   :  { %v2124_v21 = vadd.f32 %v2630_v17, %v2123_v20  ;;  %v2133_v22 = vadd.f32 %v2129_v19, %v3257_v59 }
0x13cc   :  { %v2137_v23 = vsel %vm39_vm0, %v2133_v22, 0.0  ;;  %v2132_v24 = vadd.f32 %v2124_v21, %v3255_v57  ;;  %v1268_v57 = vld [vmem:[#allocation2 + $0x150] sm:$0xff] }
0x13cd   :  { %2138 = vadd.xlane.f32.xlu1 %v2137_v23  ;;  %2901 = vmatprep.subr.mxu1 %v1268_v57 }
0x13ce   :  { %v2134_v25 = vsel %vm39_vm0, %v2132_v24, 0.0  ;;  %2902 = vmatpush3.msra.mxu1 %v1268_v57 }
0x13cf   :  { %2135 = vadd.xlane.f32.xlu0 %v2134_v25  ;;  %2903 = vmatprep.subr.mxu1 %v1267_v38 }
0x13d0   :  { %2904 = vmatpush3.msra.mxu1 %v1267_v38 }
0x13d1   :  { %2905 = vmatprep.subr.mxu1 %v1266_v40 }
0x13d2   :  { %2906 = vmatpush3.msra.mxu1 %v1266_v40 }
0x13d3   :  { %2929 = vmatprep.subr.mxu1 %v3050_v34 }
0x1456   :  { %v2139_v33 = vpop.xlane.xlu1 %2138 }
0x1457   :  { %v2141_v26 = vmul.f32 0.03125, %v2139_v33 }
0x1458   :  { %v2136_v31 = vpop.xlane.xlu0 %2135 }
0x1459   :  { %v2140_v27 = vmul.f32 0.03125, %v2136_v31  ;;  %v2143_v28 = vsub.f32 %v2133_v22, %v2141_v26 }
0x145b   :  { %v2142_v29 = vsub.f32 %v2132_v24, %v2140_v27  ;;  %v2145_v35 = vmul.f32 %v2143_v28, %v2143_v28  ;;  %v2638_v24 = vld [vmem:[%s3438_s3 + $0x11] ss:$0 sm:$0xff] }
0x145d   :  { %v2144_v30 = vmul.f32 %v2142_v29, %v2142_v29  ;;  %v2149_v59 = vsel %vm39_vm0, %v2145_v35, 0.0 }
0x145f   :  { %v2146_v32 = vsel %vm39_vm0, %v2144_v30, 0.0 }
0x1460   :  { %2147 = vadd.xlane.f32.xlu0 %v2146_v32 }
0x1464   :  { %2150 = vadd.xlane.f32.xlu0 %v2149_v59 }
0x14e9   :  { %v2148_v41 = vpop.xlane.xlu0 %2147 }
0x14ea   :  { %v2152_v42 = vmul.f32 0.03125, %v2148_v41 }
0x14ec   :  { %v2154_v43 = vadd.f32 1e-12, %v2152_v42 }
0x14ed   :  { %v2151_v44 = vpop.xlane.xlu0 %2150 }
0x14ee   :  { %3011 = vrsqrt.f32 %v2154_v43  ;;  %v2153_v45 = vmul.f32 0.03125, %v2151_v44  ;;  %v2408_v44 = vld [vmem:[%s3439_s4 + $0x30] sm:$0xff] }
0x14f0   :  { %v2155_v46 = vadd.f32 1e-12, %v2153_v45  ;;  %v2407_v45 = vld [vmem:[%s3439_s4 + $0x20] sm:$0xff] }
0x14f2   :  { %3013 = vrsqrt.f32 %v2155_v46  ;;  %v2406_v46 = vld [vmem:[%s3439_s4 + $0x10] sm:$0xff] }
0x14fb   :  { %v3012_v47 = vpop.eup %3011 }
0x14fc   :  { %v2158_v49 = vmul.f32 %v3012_v47, %v2142_v29  ;;  %v2405_v47 = vld [vmem:[%s3439_s4] sm:$0xff] }
0x14fe   :  { %v2164_v51 = vmul.f32 %v2633_v48, %v2158_v49 }
0x14ff   :  { %v3014_v53 = vpop.eup %3013 }
0x1500   :  { %v2159_v37 = vmul.f32 %v3014_v53, %v2143_v28  ;;  %v3364_v54 = vadd.f32 %v2634_v50, %v2164_v51 }
0x1502   :  { %v2165_v52 = vmul.f32 %v2633_v48, %v2159_v37  ;;  %2907 = vmatprep.mubr.msk.f32.mxu1 %vm39_vm0, %v3364_v54 }
0x1504   :  { %v2171_v55 = vadd.f32 %v2634_v50, %v2165_v52  ;;  %v2641_v52 = vld [vmem:[%s3438_s3 + $0x12] ss:$0 sm:$0xff] }
0x1506   :  { %2908 = vmatmul.mubr.msk.f32.vlgmr.msra.gmra.mxu1 %vm39_vm0, %v2171_v55 }
0x1507   :  { %2937 = vmatprep.mubr.msk.f32.mxu1 %vm3051_vm1, %v3050_v34  ;;  %2930 = vmatpush3.msra.mxu1 %v2408_v44 }
0x1508   :  { %2931 = vmatprep.subr.mxu1 %v3050_v34 }
0x1509   :  { %2932 = vmatpush3.msra.mxu1 %v2407_v45 }
0x150a   :  { %2933 = vmatprep.subr.mxu1 %v3050_v34 }
0x150b   :  { %2934 = vmatpush3.msra.mxu1 %v2406_v46 }
0x150c   :  { %2935 = vmatprep.subr.mxu1 %v3050_v34 }
0x150d   :  { %2936 = vmatpush3.msra.mxu1 %v2405_v47 }
0x150e   :  { %2940 = vmatprep.subr.mxu1 %v3050_v34 }
0x15c6   :  { %v2909_v3 = vpop.f32.mrf.mxu1 }
0x15c7   :  { %v2254_v4 = vadd.f32 %v2909_v3, %v2635_v2  ;;  %v2491_v3 = vld [vmem:[%s3439_s4 + $0x38] sm:$0xff] }
0x15c8   :  { %v2248_v5 = vpop.f32.mrf.mxu1 }
0x15c9   :  { %v2260_v6 = vmul.f32 0.044715, %v2254_v4  ;;  %v2249_v7 = vadd.f32 %v2635_v2, %v2248_v5  ;;  %v2258_v21 = vmul.f32 0.5, %v2254_v4  ;;  %v2489_v5 = vld [vmem:[%s3439_s4 + $0x18] sm:$0xff] }
0x15cb   :  { %v2262_v63 = vmul.f32 %v2260_v6, %v2254_v4  ;;  %v2259_v8 = vmul.f32 0.044715, %v2249_v7  ;;  %v2257_v19 = vmul.f32 0.5, %v2249_v7  ;;  %v2488_v6 = vld [vmem:[%s3439_s4 + $0x8] sm:$0xff] }
0x15cd   :  { %v2264_v9 = vmul.f32 %v2262_v63, %v2254_v4  ;;  %v2261_v10 = vmul.f32 %v2259_v8, %v2249_v7 }
0x15cf   :  { %v2266_v11 = vadd.f32 %v2264_v9, %v2254_v4  ;;  %v2263_v12 = vmul.f32 %v2261_v10, %v2249_v7  ;;  %v2490_v4 = vld [vmem:[%s3439_s4 + $0x28] sm:$0xff] }
0x15d1   :  { %v2268_v13 = vmul.f32 0.7978846, %v2266_v11  ;;  %v2265_v14 = vadd.f32 %v2263_v12, %v2249_v7  ;;  %v2643_v7 = vld [vmem:[%s3438_s3 + $0x2] ss:$0 sm:$0xff]  ;;  %v2645_v11 = vld [vmem:[%s3438_s3 + $0x3] ss:$0 sm:$0xff] }
0x15d3   :  { %3015 = vtanh.f32 %v2268_v13  ;;  %v2267_v15 = vmul.f32 0.7978846, %v2265_v14 }
0x15d5   :  { %3017 = vtanh.f32 %v2267_v15 }
0x15e0   :  { %v3016_v16 = vpop.eup %3015 }
0x15e1   :  { %v2272_v18 = vadd.f32 1.0, %v3016_v16 }
0x15e2   :  { %v3018_v17 = vpop.eup %3017 }
0x15e3   :  { %v2271_v20 = vadd.f32 1.0, %v3018_v17  ;;  %v2274_v23 = vmul.f32 %v2272_v18, %v2258_v21 }
0x15e5   :  { %v2273_v22 = vmul.f32 %v2271_v20, %v2257_v19 }
0x15e7   :  { %2926 = vmatprep.mubr.msk.f32.mxu0 %vm1135_vm4, %v2273_v22 }
0x15e8   :  { %2927 = vmatmul.mubr.msk.f32.vlgmr.msra.gmra.mxu0 %vm1135_vm4, %v2274_v23 }
0x16a8   :  { %v2928_v25 = vpop.f32.mrf.mxu0 }
0x16a9   :  { %v2357_v33 = vadd.f32 %v2928_v25, %v2638_v24 }
0x16aa   :  { %v2351_v26 = vpop.f32.mrf.mxu0 }
0x16ab   :  { %v2352_v31 = vadd.f32 %v2638_v24, %v2351_v26  ;;  %v2361_v27 = vadd.f32 %v2357_v33, %v2171_v55 }
0x16ad   :  { %v2365_v28 = vsel %vm39_vm0, %v2361_v27, 0.0  ;;  %v2360_v29 = vadd.f32 %v2352_v31, %v3364_v54 }
0x16ae   :  { %2366 = vadd.xlane.f32.xlu0 %v2365_v28 }
0x16af   :  { %v2362_v30 = vsel %vm39_vm0, %v2360_v29, 0.0 }
0x16b0   :  { %2363 = vadd.xlane.f32.xlu1 %v2362_v30 }
0x1737   :  { %v2367_v32 = vpop.xlane.xlu0 %2366 }
0x1738   :  { %v2369_v35 = vmul.f32 0.03125, %v2367_v32 }
0x1739   :  { %v2364_v59 = vpop.xlane.xlu1 %2363 }
0x173a   :  { %v2371_v36 = vsub.f32 %v2361_v27, %v2369_v35  ;;  %v2368_v57 = vmul.f32 0.03125, %v2364_v59 }
0x173c   :  { %v2370_v38 = vsub.f32 %v2360_v29, %v2368_v57  ;;  %v2373_v40 = vmul.f32 %v2371_v36, %v2371_v36 }
0x173e   :  { %v2377_v41 = vsel %vm39_vm0, %v2373_v40, 0.0  ;;  %v2372_v42 = vmul.f32 %v2370_v38, %v2370_v38 }
0x173f   :  { %2378 = vadd.xlane.f32.xlu0 %v2377_v41 }
0x1740   :  { %v2374_v43 = vsel %vm39_vm0, %v2372_v42, 0.0 }
0x1741   :  { %2375 = vadd.xlane.f32.xlu1 %v2374_v43 }
0x17c8   :  { %v2379_v48 = vpop.xlane.xlu0 %2378 }
0x17c9   :  { %v2381_v49 = vmul.f32 0.03125, %v2379_v48 }
0x17ca   :  { %v2376_v50 = vpop.xlane.xlu1 %2375 }
0x17cb   :  { %v2383_v51 = vadd.f32 1e-12, %v2381_v49  ;;  %v2380_v53 = vmul.f32 0.03125, %v2376_v50 }
0x17cd   :  { %3019 = vrsqrt.f32 %v2383_v51  ;;  %v2382_v37 = vadd.f32 1e-12, %v2380_v53 }
0x17cf   :  { %3021 = vrsqrt.f32 %v2382_v37 }
0x17da   :  { %v3020_v54 = vpop.eup %3019 }
0x17db   :  { %v2387_v55 = vmul.f32 %v3020_v54, %v2371_v36 }
0x17dc   :  { %v3022_v56 = vpop.eup %3021 }
0x17dd   :  { %v2386_v61 = vmul.f32 %v3022_v56, %v2370_v38  ;;  %v2393_v58 = vmul.f32 %v2641_v52, %v2387_v55 }
0x17df   :  { %v2392_v39 = vmul.f32 %v2641_v52, %v2386_v61  ;;  %v2399_v62 = vadd.f32 %v2642_v60, %v2393_v58 }
0x17e1   :  { %v2398_v0 = vadd.f32 %v2642_v60, %v2392_v39  ;;  %v2401_v1 = vrot.slane %v2399_v62, 7 }
0x17e3   :  { %v2404_v2 = vsel %vm2403_vm5, %v2398_v0, %v2401_v1 }
0x17e4   :  { %2938 = vmatmul.mubr.msk.f32.vlgmr.msra.gmra.mxu1 %vm39_vm0, %v2404_v2 }
0x17e5   :  { %2948 = vmatprep.mubr.msk.f32.mxu1 %vm3051_vm1, %v3050_v34  ;;  %2941 = vmatpush3.msra.mxu1 %v2491_v3 }
0x17e6   :  { %2942 = vmatprep.subr.mxu1 %v3050_v34 }
0x17e7   :  { %2943 = vmatpush3.msra.mxu1 %v2490_v4 }
0x17e8   :  { %2944 = vmatprep.subr.mxu1 %v3050_v34 }
0x17e9   :  { %2945 = vmatpush3.msra.mxu1 %v2489_v5 }
0x17ea   :  { %2946 = vmatprep.subr.mxu1 %v3050_v34 }
0x17eb   :  { %2947 = vmatpush3.msra.mxu1 %v2488_v6 }
0x18a4   :  { %v2483_v63 = vpop.f32.mrf.mxu1 }
0x18a5   :  { %v2484_v8 = vadd.f32 %v2643_v7, %v2483_v63 }
0x18a6   :  { %v2939_v9 = vpop.f32.mrf.mxu1 }
0x18a7   :  { %3023 = vtanh.f32 %v2484_v8 }
0x18b4   :  { %v3024_v10 = vpop.eup %3023 }
0x18b5   :  { %2949 = vmatmul.mubr.msk.f32.vlgmr.msra.gmra.mxu1 %vm39_vm0, %v3024_v10  ;;  %v2570_v12 = vsel %vm39_vm0, %v3024_v10, 0.0 }
0x18b6   :  { %v2572_v14 = vrot.slane %v2570_v12, 6 }
0x1975   :  { %v2566_v13 = vpop.f32.mrf.mxu1 }
0x1976   :  { %v2567_v34 = vadd.f32 %v2645_v11, %v2566_v13 }
0x1977   :  { %v2950_v15 = vpop.f32.mrf.mxu1 }
0x1978   :  { %v2575_v16 = vsel %vm2574_vm6, %v2567_v34, %v2572_v14 }
0x1979   :  { %v2577_v17 = vsel %vm2576_vm7, %v2575_v16, 0.0 }
0x197a   :  { %2578 = vst [vmem:[%s3440_s5] sm:$0xff] %v2577_v17 }
0x197b   :  { %2583 = vsyncpa [#allocation3], 1 }

</bundles_post_ra>
